<compile_context>
chip_gen: v6e
topology: v6e:2x2x1
jax: 0.10.0
libtpu: 0.0.40
codegen_flags: <defaults>
</compile_context>

<pallas_src>
import jax
import jax.numpy as jnp
from jax import lax
from jax.experimental import pallas as pl
from jax.experimental.pallas import tpu as pltpu  # noqa: F401  (TPU backend assumed)

# ---- model hyper-params ---------------------------------------------------------
B = 2         # batch
T = 8         # decoder sequence length
S = 12        # encoder sequence length
C = 32        # n_emb
N_HEAD = 4    # n_head
DH = C // N_HEAD
HIDDEN = 4 * C

BT = B * T            # 16 packed decoder rows
S_PAD = 32            # per-head packed key length for cross-attn (B*S=24 padded to 32)
NEG = -1e30

# rows of the packed (17, 128) vector table
#  0 ln1_g  1 ln1_b  2 ln2_g  3 ln2_b  4 ln3_g  5 ln3_b
#  6 bqkv1(96)  7 bo1(32)  8 bq2(32)  9 bkv2(64)  10 bo2(32)  11 bf1(128)  12 bf2(32)
#  13..16 chan_sel (per-head channel selector, H rows x C)


# ---- Pallas kernel ----------------------------------------------------------------
def decoder_kernel(dec_ref, enc_ref, bias1_ref, bias2_ref, km1_ref, km2_ref,
                   wqkv1_ref, wkv2_ref, wsq_ref, wf1_ref, wf2_ref, vec_ref, out_ref):
    f32 = jnp.float32
    bf16 = jnp.bfloat16
    scale = 1.0 / (DH ** 0.5)

    vec = vec_ref[...]                                    # (17,128) f32

    def vrow(i, n):                                       # one packed bias/LN vector
        return vec[i:i + 1, :n]                           # (1, n)

    chan_sel = vec[13:13 + N_HEAD, :C]                    # (H, C) per-head channel 1/0

    def mm(a_bf16, b_bf16):                               # A @ B, bf16 ops, f32 accum
        return jnp.dot(a_bf16, b_bf16, preferred_element_type=f32)

    def ln(x, g, b):                                      # f32 LayerNorm, eps=1e-5
        mu = jnp.mean(x, axis=-1, keepdims=True)
        xc = x - mu
        var = jnp.mean(xc * xc, axis=-1, keepdims=True)
        return xc * lax.rsqrt(var + 1e-5) * g + b

    def attention(q, kp, vp, bias, lp, wo, bo):
        # q: (BT, C) f32; kp/vp: (H*lp, C) bf16 block-diag packed over (head, batch, key);
        # bias: (BT, H*lp) f32 additive mask (causal / key-pad / cross-batch / lane-pad).
        s = lax.dot_general(q.astype(bf16), kp, (((1,), (1,)), ((), ())),
                            preferred_element_type=f32) * scale + bias
        s = s - jnp.max(s, axis=-1, keepdims=True)        # per-row shift (valid per head)
        e = jnp.exp(s)                                    # (BT, H*lp) f32
        o_un = mm(e.astype(bf16), vp)                     # (BT, C) un-normalized, heads concat
        # per-head softmax denominators in f32, broadcast onto that head's channels
        den = jnp.sum(e[:, 0:lp], axis=-1, keepdims=True) * chan_sel[0:1, :]
        for h in range(1, N_HEAD):
            dh = jnp.sum(e[:, h * lp:(h + 1) * lp], axis=-1, keepdims=True)
            den = den + dh * chan_sel[h:h + 1, :]
        o = o_un * pl.reciprocal(den, approx=True)        # normalized attention output
        return mm(o.astype(bf16), wo) + bo

    x0 = dec_ref[...]                                     # (BT, C) f32

    # --- causal self-attention: x1 = x0 + MSA(LN1(x0)) ---------------------------
    h1 = ln(x0, vrow(0, C), vrow(1, C))
    qkv = mm(h1.astype(bf16), wqkv1_ref[...]) + vrow(6, 3 * C)   # fused Q|K|V, one matmul
    km1 = km1_ref[...]                                           # (H*BT, C) f32
    kp1 = (jnp.tile(qkv[:, C:2 * C], (N_HEAD, 1)) * km1).astype(bf16)
    vp1 = (jnp.tile(qkv[:, 2 * C:3 * C], (N_HEAD, 1)) * km1).astype(bf16)
    x1 = x0 + attention(qkv[:, 0:C], kp1, vp1, bias1_ref[...], BT,
                        wsq_ref[0], vrow(7, C))

    # --- cross attention: x2 = x1 + MSA(LN2(x1), enc) -----------------------------
    h2 = ln(x1, vrow(2, C), vrow(3, C))
    q2 = mm(h2.astype(bf16), wsq_ref[1]) + vrow(8, C)
    kv = mm(enc_ref[...].astype(bf16), wkv2_ref[...]) + vrow(9, 2 * C)   # (S_PAD, 2C)
    km2 = km2_ref[...]                                                   # (H*S_PAD, C)
    kp2 = (jnp.tile(kv[:, 0:C], (N_HEAD, 1)) * km2).astype(bf16)
    vp2 = (jnp.tile(kv[:, C:2 * C], (N_HEAD, 1)) * km2).astype(bf16)
    x2 = x1 + attention(q2, kp2, vp2, bias2_ref[...], S_PAD,
                        wsq_ref[2], vrow(10, C))

    # --- feed-forward: out = x2 + FFN(LN3(x2)) ------------------------------------
    h3 = ln(x2, vrow(4, C), vrow(5, C))
    f = mm(h3.astype(bf16), wf1_ref[...]) + vrow(11, HIDDEN)
    f = jax.nn.gelu(f, approximate=True)   # TODO(synk): FeedForward source not given; tanh-GELU assumed
    f = mm(f.astype(bf16), wf2_ref[...]) + vrow(12, C)
    out_ref[...] = x2 + f


# ---- parameter packing & constant masks (hoisted, one-time) -----------------------
def pack_params(p):
    bf16 = jnp.bfloat16
    wqkv1 = jnp.concatenate([p["wq1"], p["wk1"], p["wv1"]], axis=1).astype(bf16)  # (C,3C)
    wkv2 = jnp.concatenate([p["wk2"], p["wv2"]], axis=1).astype(bf16)             # (C,2C)
    wsq = jnp.stack([p["wo1"], p["wq2"], p["wo2"]], axis=0).astype(bf16)          # (3,C,C)
    wf1 = p["wf1"].astype(bf16)                                                   # (C,4C)
    wf2 = p["wf2"].astype(bf16)                                                   # (4C,C)

    def pad128(v):
        return jnp.pad(v, ((0, 0), (0, 128 - v.shape[1])))

    head = lax.broadcasted_iota(jnp.int32, (N_HEAD, C), 0)
    chan = lax.broadcasted_iota(jnp.int32, (N_HEAD, C), 1) // DH
    chan_sel = (head == chan).astype(jnp.float32)                                 # (H, C)

    vec = jnp.concatenate([
        pad128(p["ln1_g"]), pad128(p["ln1_b"]),
        pad128(p["ln2_g"]), pad128(p["ln2_b"]),
        pad128(p["ln3_g"]), pad128(p["ln3_b"]),
        pad128(jnp.concatenate([p["bq1"], p["bk1"], p["bv1"]], axis=1)),
        pad128(p["bo1"]),
        pad128(p["bq2"]),
        pad128(jnp.concatenate([p["bk2"], p["bv2"]], axis=1)),
        pad128(p["bo2"]),
        pad128(p["bf1"]),
        pad128(p["bf2"]),
        pad128(chan_sel),
    ], axis=0).astype(jnp.float32)                                                # (17,128)
    return wqkv1, wkv2, wsq, wf1, wf2, vec


def make_constants():
    # km1: block-diagonal head/channel mask for self-attn K/V packing (H*BT, C)
    r1 = lax.broadcasted_iota(jnp.int32, (N_HEAD * BT, C), 0)
    c1 = lax.broadcasted_iota(jnp.int32, (N_HEAD * BT, C), 1)
    km1 = ((r1 // BT) == (c1 // DH)).astype(jnp.float32)

    # km2: same for cross-attn, also zeroing the S_PAD padding rows (H*S_PAD, C)
    r2 = lax.broadcasted_iota(jnp.int32, (N_HEAD * S_PAD, C), 0)
    c2 = lax.broadcasted_iota(jnp.int32, (N_HEAD * S_PAD, C), 1)
    km2 = jnp.logical_and((r2 // S_PAD) == (c2 // DH),
                          (r2 % S_PAD) < B * S).astype(jnp.float32)

    # cross-attn additive bias: query batch attends only to its own encoder rows,
    # pad columns get -1e30 (constant: cross-attn has no key-padding mask in the module)
    rc = lax.broadcasted_iota(jnp.int32, (BT, S_PAD), 0)
    cc = lax.broadcasted_iota(jnp.int32, (BT, S_PAD), 1)
    allow2 = jnp.logical_and((rc // T) == (cc // S), cc < B * S)
    bias2 = jnp.tile(jnp.where(allow2, 0.0, NEG).astype(jnp.float32), (1, N_HEAD))
    return km1, km2, bias2


def make_decoder(params):
    """Pack params/constants once; return a jitted decoder_block(dec_in, enc_out, pad_mask)."""
    wqkv1, wkv2, wsq, wf1, wf2, vec = pack_params(params)
    km1, km2, bias2 = make_constants()
    cost = pl.CostEstimate(flops=1_100_000, transcendentals=8_192, bytes_accessed=100_000)

    @jax.jit
    def decoder_block(dec_in, enc_out, pad_mask):
        """Mirror of Decoder.forward: returns (x, enc_out, pad_masks); `device` is dropped."""
        dec_flat = dec_in.reshape(BT, C)
        enc_flat = jnp.pad(enc_out.reshape(B * S, C), ((0, S_PAD - B * S), (0, 0)))

        # self-attn additive bias: same batch AND causal AND key not padded, tiled per head
        row = lax.broadcasted_iota(jnp.int32, (BT, BT), 0)
        col = lax.broadcasted_iota(jnp.int32, (BT, BT), 1)
        same_b = (row // T) == (col // T)
        causal = (col % T) <= (row % T)
        key_ok = (pad_mask.reshape(BT) > 0.5)[None, :]
        allow1 = jnp.logical_and(jnp.logical_and(same_b, causal), key_ok)
        bias1 = jnp.tile(jnp.where(allow1, 0.0, NEG).astype(jnp.float32), (1, N_HEAD))

        out_flat = pl.pallas_call(
            decoder_kernel,
            out_shape=jax.ShapeDtypeStruct((BT, C), jnp.float32),
            cost_estimate=cost,
        )(dec_flat, enc_flat, bias1, bias2, km1, km2,
          wqkv1, wkv2, wsq, wf1, wf2, vec)

        return out_flat.reshape(B, T, C), enc_out, pad_mask

    return decoder_block


# ---- pure-JAX reference (straightforward per-head math, true module semantics) ----
def reference_decoder(dec_in, enc_out, pad_mask, p):
    scale = 1.0 / (DH ** 0.5)

    def ln(x, g, b):
        mu = jnp.mean(x, axis=-1, keepdims=True)
        xc = x - mu
        var = jnp.mean(xc * xc, axis=-1, keepdims=True)
        return xc * lax.rsqrt(var + 1e-5) * g + b

    def softmax(s):
        s = s - jnp.max(s, axis=-1, keepdims=True)
        e = jnp.exp(s)
        return e / jnp.sum(e, axis=-1, keepdims=True)

    def mha(xq, xkv, pre, mask):
        q = xq @ p[f"wq{pre}"] + p[f"bq{pre}"]
        k = xkv @ p[f"wk{pre}"] + p[f"bk{pre}"]
        v = xkv @ p[f"wv{pre}"] + p[f"bv{pre}"]
        outs = []
        for h in range(N_HEAD):
            sl = slice(h * DH, (h + 1) * DH)
            s = (q[:, sl] @ k[:, sl].T) * scale
            if mask is not None:
                s = jnp.where(mask, s, -1e30)
            outs.append(softmax(s) @ v[:, sl])
        return jnp.concatenate(outs, axis=-1) @ p[f"wo{pre}"] + p[f"bo{pre}"]

    def one(x0, enc, pad):
        row = lax.broadcasted_iota(jnp.int32, (T, T), 0)
        col = lax.broadcasted_iota(jnp.int32, (T, T), 1)
        mask = jnp.logical_and(col <= row, pad > 0.5)      # (T,T) & (1,T) -> (T,T)
        h1 = ln(x0, p["ln1_g"], p["ln1_b"])
        x1 = x0 + mha(h1, h1, "1", mask)
        h2 = ln(x1, p["ln2_g"], p["ln2_b"])
        x2 = x1 + mha(h2, enc, "2", None)
        h3 = ln(x2, p["ln3_g"], p["ln3_b"])
        f = h3 @ p["wf1"] + p["bf1"]
        f = jax.nn.gelu(f, approximate=True)
        f = f @ p["wf2"] + p["bf2"]
        return x2 + f

    return jax.vmap(one)(dec_in, enc_out, pad_mask)


# ---- deterministic parameter init --------------------------------------------------
def init_params(key):
    ks = iter(jax.random.split(key, 32))

    def w(shape, std=0.02):
        return jax.random.normal(next(ks), shape, jnp.float32) * std

    p = {}
    for i in ("1", "2", "3"):
        p[f"ln{i}_g"] = jnp.ones((1, C), jnp.float32)
        p[f"ln{i}_b"] = jnp.zeros((1, C), jnp.float32)
    for pre in ("1", "2"):  # self-attn / cross-attn
        p[f"wq{pre}"] = w((C, C)); p[f"bq{pre}"] = w((1, C), 0.01)
        p[f"wk{pre}"] = w((C, C)); p[f"bk{pre}"] = w((1, C), 0.01)
        p[f"wv{pre}"] = w((C, C)); p[f"bv{pre}"] = w((1, C), 0.01)
        p[f"wo{pre}"] = w((C, C)); p[f"bo{pre}"] = w((1, C), 0.01)
    p["wf1"] = w((C, HIDDEN)); p["bf1"] = w((1, HIDDEN), 0.01)
    p["wf2"] = w((HIDDEN, C)); p["bf2"] = w((1, C), 0.01)
    return p


if __name__ == "__main__":
    root = jax.random.PRNGKey(0)
    k_dec, k_enc, k_par = jax.random.split(root, 3)

    dec_in = jax.random.normal(k_dec, (B, T, C), jnp.float32)
    enc_out = jax.random.normal(k_enc, (B, S, C), jnp.float32)
    pad_mask = jnp.ones((B, 1, T), jnp.float32)
    pad_mask = pad_mask.at[1, 0, -2:].set(0.0)   # batch 1: last two decoder tokens are padding

    params = init_params(k_par)

    decoder_block = make_decoder(params)          # packs weights/constants once (hoisted)
    x, enc_ret, pad_ret = decoder_block(dec_in, enc_out, pad_mask)
    x = jax.block_until_ready(x)

    ref = jax.block_until_ready(reference_decoder(dec_in, enc_out, pad_mask, params))
    assert x.shape == (B, T, C)
    # tolerance covers bf16 matmul operands + approx reciprocal in the kernel vs f32 reference
    max_err = float(jnp.max(jnp.abs(x - ref)))
    assert jnp.allclose(x, ref, atol=5e-3, rtol=5e-3), f"Pallas mismatch, max err {max_err}"

    print("KERNEL_OK")
</pallas_src>

<mosaic_0001>
module attributes {stable_mosaic.version = 11 : i64} {
  func.func @decoder_kernel(%arg0: memref<16x32xf32, #tpu.memory_space<vmem>>, %arg1: memref<32x32xf32, #tpu.memory_space<vmem>>, %arg2: memref<16x64xf32, #tpu.memory_space<vmem>>, %arg3: memref<16x128xf32, #tpu.memory_space<vmem>>, %arg4: memref<64x32xf32, #tpu.memory_space<vmem>>, %arg5: memref<128x32xf32, #tpu.memory_space<vmem>>, %arg6: memref<32x96xbf16, #tpu.memory_space<vmem>>, %arg7: memref<32x64xbf16, #tpu.memory_space<vmem>>, %arg8: memref<3x32x32xbf16, #tpu.memory_space<vmem>>, %arg9: memref<32x128xbf16, #tpu.memory_space<vmem>>, %arg10: memref<128x32xbf16, #tpu.memory_space<vmem>>, %arg11: memref<17x128xf32, #tpu.memory_space<vmem>>, %arg12: memref<16x32xf32, #tpu.memory_space<vmem>>) attributes {dimension_semantics = [], scalar_prefetch = 0 : i64, scratch_operands = 0 : i64, tpu.core_type = #tpu.core_type<tc>} {
    %c0 = arith.constant 0 : index
    %c0_0 = arith.constant 0 : index
    %0 = vector.load %arg11[%c0, %c0_0] : memref<17x128xf32, #tpu.memory_space<vmem>>, vector<17x128xf32>
    %1 = vector.extract_strided_slice %0 {offsets = [13, 0], sizes = [4, 32], strides = [1, 1]} : vector<17x128xf32> to vector<4x32xf32>
    %c0_1 = arith.constant 0 : index
    %c0_2 = arith.constant 0 : index
    %2 = vector.load %arg0[%c0_1, %c0_2] : memref<16x32xf32, #tpu.memory_space<vmem>>, vector<16x32xf32>
    %3 = vector.extract_strided_slice %0 {offsets = [0, 0], sizes = [1, 32], strides = [1, 1]} : vector<17x128xf32> to vector<1x32xf32>
    %4 = vector.extract_strided_slice %0 {offsets = [1, 0], sizes = [1, 32], strides = [1, 1]} : vector<17x128xf32> to vector<1x32xf32>
    %cst = arith.constant dense<0.000000e+00> : vector<16xf32>
    %5 = vector.multi_reduction <add>, %2, %cst [1] : vector<16x32xf32> to vector<16xf32>
    %6 = vector.shape_cast %5 : vector<16xf32> to vector<16x1xf32>
    %cst_3 = arith.constant 3.200000e+01 : f32
    %7 = vector.broadcast %cst_3 : f32 to vector<16x1xf32>
    %8 = arith.divf %6, %7 : vector<16x1xf32>
    %9 = vector.broadcast %8 : vector<16x1xf32> to vector<16x32xf32>
    %10 = arith.subf %2, %9 : vector<16x32xf32>
    %11 = arith.mulf %10, %10 : vector<16x32xf32>
    %cst_4 = arith.constant dense<0.000000e+00> : vector<16xf32>
    %12 = vector.multi_reduction <add>, %11, %cst_4 [1] : vector<16x32xf32> to vector<16xf32>
    %13 = vector.shape_cast %12 : vector<16xf32> to vector<16x1xf32>
    %cst_5 = arith.constant 3.200000e+01 : f32
    %14 = vector.broadcast %cst_5 : f32 to vector<16x1xf32>
    %15 = arith.divf %13, %14 : vector<16x1xf32>
    %cst_6 = arith.constant 9.99999974E-6 : f32
    %16 = vector.broadcast %cst_6 : f32 to vector<16x1xf32>
    %17 = arith.addf %15, %16 : vector<16x1xf32>
    %18 = math.rsqrt %17 : vector<16x1xf32>
    %19 = vector.broadcast %18 : vector<16x1xf32> to vector<16x32xf32>
    %20 = arith.mulf %10, %19 : vector<16x32xf32>
    %21 = vector.broadcast %3 : vector<1x32xf32> to vector<16x32xf32>
    %22 = arith.mulf %20, %21 : vector<16x32xf32>
    %23 = vector.broadcast %4 : vector<1x32xf32> to vector<16x32xf32>
    %24 = arith.addf %22, %23 : vector<16x32xf32>
    %25 = arith.truncf %24 : vector<16x32xf32> to vector<16x32xbf16>
    %c0_7 = arith.constant 0 : index
    %c0_8 = arith.constant 0 : index
    %26 = vector.load %arg6[%c0_7, %c0_8] : memref<32x96xbf16, #tpu.memory_space<vmem>>, vector<32x96xbf16>
    %cst_9 = arith.constant dense<0.000000e+00> : vector<16x96xf32>
    %27 = tpu.matmul %25, %26, %cst_9 {dimension_numbers = #tpu.dot_dimension_numbers<[1], [0], [0], [1], [0, 0, 1, 1], [], []>} : vector<16x32xbf16>, vector<32x96xbf16>, vector<16x96xf32> -> vector<16x96xf32>
    %28 = vector.extract_strided_slice %0 {offsets = [6, 0], sizes = [1, 96], strides = [1, 1]} : vector<17x128xf32> to vector<1x96xf32>
    %29 = vector.broadcast %28 : vector<1x96xf32> to vector<16x96xf32>
    %30 = arith.addf %27, %29 : vector<16x96xf32>
    %c0_10 = arith.constant 0 : index
    %c0_11 = arith.constant 0 : index
    %31 = vector.load %arg4[%c0_10, %c0_11] : memref<64x32xf32, #tpu.memory_space<vmem>>, vector<64x32xf32>
    %32 = vector.extract_strided_slice %30 {offsets = [0, 32], sizes = [16, 32], strides = [1, 1]} : vector<16x96xf32> to vector<16x32xf32>
    %33 = tpu.concatenate %32, %32, %32, %32 in 0 : vector<16x32xf32>, vector<16x32xf32>, vector<16x32xf32>, vector<16x32xf32> -> vector<64x32xf32>
    %34 = arith.mulf %33, %31 : vector<64x32xf32>
    %35 = arith.truncf %34 : vector<64x32xf32> to vector<64x32xbf16>
    %36 = vector.extract_strided_slice %30 {offsets = [0, 64], sizes = [16, 32], strides = [1, 1]} : vector<16x96xf32> to vector<16x32xf32>
    %37 = tpu.concatenate %36, %36, %36, %36 in 0 : vector<16x32xf32>, vector<16x32xf32>, vector<16x32xf32>, vector<16x32xf32> -> vector<64x32xf32>
    %38 = arith.mulf %37, %31 : vector<64x32xf32>
    %39 = arith.truncf %38 : vector<64x32xf32> to vector<64x32xbf16>
    %40 = vector.extract_strided_slice %30 {offsets = [0, 0], sizes = [16, 32], strides = [1, 1]} : vector<16x96xf32> to vector<16x32xf32>
    %c0_12 = arith.constant 0 : index
    %c0_13 = arith.constant 0 : index
    %41 = vector.load %arg2[%c0_12, %c0_13] : memref<16x64xf32, #tpu.memory_space<vmem>>, vector<16x64xf32>
    %c0_14 = arith.constant 0 : index
    %c0_15 = arith.constant 0 : index
    %c0_16 = arith.constant 0 : index
    %42 = vector.load %arg8[%c0_14, %c0_15, %c0_16] : memref<3x32x32xbf16, #tpu.memory_space<vmem>>, vector<1x32x32xbf16>
    %43 = vector.shape_cast %42 : vector<1x32x32xbf16> to vector<32x32xbf16>
    %44 = vector.extract_strided_slice %0 {offsets = [7, 0], sizes = [1, 32], strides = [1, 1]} : vector<17x128xf32> to vector<1x32xf32>
    %45 = arith.truncf %40 : vector<16x32xf32> to vector<16x32xbf16>
    %cst_17 = arith.constant dense<0.000000e+00> : vector<16x64xf32>
    %46 = tpu.matmul %45, %35, %cst_17 {dimension_numbers = #tpu.dot_dimension_numbers<[1], [1], [0], [0], [0, 0, 1, 0], [], []>} : vector<16x32xbf16>, vector<64x32xbf16>, vector<16x64xf32> -> vector<16x64xf32>
    %cst_18 = arith.constant 0.353553385 : f32
    %47 = vector.broadcast %cst_18 : f32 to vector<16x64xf32>
    %48 = arith.mulf %46, %47 : vector<16x64xf32>
    %49 = arith.addf %48, %41 : vector<16x64xf32>
    %cst_19 = arith.constant dense<0xFF800000> : vector<16xf32>
    %50 = vector.multi_reduction <maximumf>, %49, %cst_19 [1] : vector<16x64xf32> to vector<16xf32>
    %51 = vector.shape_cast %50 : vector<16xf32> to vector<16x1xf32>
    %52 = vector.broadcast %51 : vector<16x1xf32> to vector<16x64xf32>
    %53 = arith.subf %49, %52 : vector<16x64xf32>
    %54 = math.exp %53 : vector<16x64xf32>
    %55 = arith.truncf %54 : vector<16x64xf32> to vector<16x64xbf16>
    %cst_20 = arith.constant dense<0.000000e+00> : vector<16x32xf32>
    %56 = tpu.matmul %55, %39, %cst_20 {dimension_numbers = #tpu.dot_dimension_numbers<[1], [0], [0], [1], [0, 0, 1, 1], [], []>} : vector<16x64xbf16>, vector<64x32xbf16>, vector<16x32xf32> -> vector<16x32xf32>
    %57 = vector.extract_strided_slice %54 {offsets = [0, 0], sizes = [16, 16], strides = [1, 1]} : vector<16x64xf32> to vector<16x16xf32>
    %cst_21 = arith.constant dense<0.000000e+00> : vector<16xf32>
    %58 = vector.multi_reduction <add>, %57, %cst_21 [1] : vector<16x16xf32> to vector<16xf32>
    %59 = vector.shape_cast %58 : vector<16xf32> to vector<16x1xf32>
    %60 = vector.extract_strided_slice %1 {offsets = [0, 0], sizes = [1, 32], strides = [1, 1]} : vector<4x32xf32> to vector<1x32xf32>
    %61 = vector.broadcast %59 : vector<16x1xf32> to vector<16x32xf32>
    %62 = vector.broadcast %60 : vector<1x32xf32> to vector<16x32xf32>
    %63 = arith.mulf %61, %62 : vector<16x32xf32>
    %64 = vector.extract_strided_slice %54 {offsets = [0, 16], sizes = [16, 16], strides = [1, 1]} : vector<16x64xf32> to vector<16x16xf32>
    %cst_22 = arith.constant dense<0.000000e+00> : vector<16xf32>
    %65 = vector.multi_reduction <add>, %64, %cst_22 [1] : vector<16x16xf32> to vector<16xf32>
    %66 = vector.shape_cast %65 : vector<16xf32> to vector<16x1xf32>
    %67 = vector.extract_strided_slice %1 {offsets = [1, 0], sizes = [1, 32], strides = [1, 1]} : vector<4x32xf32> to vector<1x32xf32>
    %68 = vector.broadcast %66 : vector<16x1xf32> to vector<16x32xf32>
    %69 = vector.broadcast %67 : vector<1x32xf32> to vector<16x32xf32>
    %70 = arith.mulf %68, %69 : vector<16x32xf32>
    %71 = arith.addf %63, %70 : vector<16x32xf32>
    %72 = vector.extract_strided_slice %54 {offsets = [0, 32], sizes = [16, 16], strides = [1, 1]} : vector<16x64xf32> to vector<16x16xf32>
    %cst_23 = arith.constant dense<0.000000e+00> : vector<16xf32>
    %73 = vector.multi_reduction <add>, %72, %cst_23 [1] : vector<16x16xf32> to vector<16xf32>
    %74 = vector.shape_cast %73 : vector<16xf32> to vector<16x1xf32>
    %75 = vector.extract_strided_slice %1 {offsets = [2, 0], sizes = [1, 32], strides = [1, 1]} : vector<4x32xf32> to vector<1x32xf32>
    %76 = vector.broadcast %74 : vector<16x1xf32> to vector<16x32xf32>
    %77 = vector.broadcast %75 : vector<1x32xf32> to vector<16x32xf32>
    %78 = arith.mulf %76, %77 : vector<16x32xf32>
    %79 = arith.addf %71, %78 : vector<16x32xf32>
    %80 = vector.extract_strided_slice %54 {offsets = [0, 48], sizes = [16, 16], strides = [1, 1]} : vector<16x64xf32> to vector<16x16xf32>
    %cst_24 = arith.constant dense<0.000000e+00> : vector<16xf32>
    %81 = vector.multi_reduction <add>, %80, %cst_24 [1] : vector<16x16xf32> to vector<16xf32>
    %82 = vector.shape_cast %81 : vector<16xf32> to vector<16x1xf32>
    %83 = vector.extract_strided_slice %1 {offsets = [3, 0], sizes = [1, 32], strides = [1, 1]} : vector<4x32xf32> to vector<1x32xf32>
    %84 = vector.broadcast %82 : vector<16x1xf32> to vector<16x32xf32>
    %85 = vector.broadcast %83 : vector<1x32xf32> to vector<16x32xf32>
    %86 = arith.mulf %84, %85 : vector<16x32xf32>
    %87 = arith.addf %79, %86 : vector<16x32xf32>
    %88 = tpu.reciprocal %87 {approx = true} : vector<16x32xf32> -> vector<16x32xf32>
    %89 = arith.mulf %56, %88 : vector<16x32xf32>
    %90 = arith.truncf %89 : vector<16x32xf32> to vector<16x32xbf16>
    %cst_25 = arith.constant dense<0.000000e+00> : vector<16x32xf32>
    %91 = tpu.matmul %90, %43, %cst_25 {dimension_numbers = #tpu.dot_dimension_numbers<[1], [0], [0], [1], [0, 0, 1, 1], [], []>} : vector<16x32xbf16>, vector<32x32xbf16>, vector<16x32xf32> -> vector<16x32xf32>
    %92 = vector.broadcast %44 : vector<1x32xf32> to vector<16x32xf32>
    %93 = arith.addf %91, %92 : vector<16x32xf32>
    %94 = arith.addf %2, %93 : vector<16x32xf32>
    %95 = vector.extract_strided_slice %0 {offsets = [2, 0], sizes = [1, 32], strides = [1, 1]} : vector<17x128xf32> to vector<1x32xf32>
    %96 = vector.extract_strided_slice %0 {offsets = [3, 0], sizes = [1, 32], strides = [1, 1]} : vector<17x128xf32> to vector<1x32xf32>
    %cst_26 = arith.constant dense<0.000000e+00> : vector<16xf32>
    %97 = vector.multi_reduction <add>, %94, %cst_26 [1] : vector<16x32xf32> to vector<16xf32>
    %98 = vector.shape_cast %97 : vector<16xf32> to vector<16x1xf32>
    %cst_27 = arith.constant 3.200000e+01 : f32
    %99 = vector.broadcast %cst_27 : f32 to vector<16x1xf32>
    %100 = arith.divf %98, %99 : vector<16x1xf32>
    %101 = vector.broadcast %100 : vector<16x1xf32> to vector<16x32xf32>
    %102 = arith.subf %94, %101 : vector<16x32xf32>
    %103 = arith.mulf %102, %102 : vector<16x32xf32>
    %cst_28 = arith.constant dense<0.000000e+00> : vector<16xf32>
    %104 = vector.multi_reduction <add>, %103, %cst_28 [1] : vector<16x32xf32> to vector<16xf32>
    %105 = vector.shape_cast %104 : vector<16xf32> to vector<16x1xf32>
    %cst_29 = arith.constant 3.200000e+01 : f32
    %106 = vector.broadcast %cst_29 : f32 to vector<16x1xf32>
    %107 = arith.divf %105, %106 : vector<16x1xf32>
    %cst_30 = arith.constant 9.99999974E-6 : f32
    %108 = vector.broadcast %cst_30 : f32 to vector<16x1xf32>
    %109 = arith.addf %107, %108 : vector<16x1xf32>
    %110 = math.rsqrt %109 : vector<16x1xf32>
    %111 = vector.broadcast %110 : vector<16x1xf32> to vector<16x32xf32>
    %112 = arith.mulf %102, %111 : vector<16x32xf32>
    %113 = vector.broadcast %95 : vector<1x32xf32> to vector<16x32xf32>
    %114 = arith.mulf %112, %113 : vector<16x32xf32>
    %115 = vector.broadcast %96 : vector<1x32xf32> to vector<16x32xf32>
    %116 = arith.addf %114, %115 : vector<16x32xf32>
    %117 = arith.truncf %116 : vector<16x32xf32> to vector<16x32xbf16>
    %c1 = arith.constant 1 : index
    %c0_31 = arith.constant 0 : index
    %c0_32 = arith.constant 0 : index
    %118 = vector.load %arg8[%c1, %c0_31, %c0_32] : memref<3x32x32xbf16, #tpu.memory_space<vmem>>, vector<1x32x32xbf16>
    %119 = vector.shape_cast %118 : vector<1x32x32xbf16> to vector<32x32xbf16>
    %cst_33 = arith.constant dense<0.000000e+00> : vector<16x32xf32>
    %120 = tpu.matmul %117, %119, %cst_33 {dimension_numbers = #tpu.dot_dimension_numbers<[1], [0], [0], [1], [0, 0, 1, 1], [], []>} : vector<16x32xbf16>, vector<32x32xbf16>, vector<16x32xf32> -> vector<16x32xf32>
    %121 = vector.extract_strided_slice %0 {offsets = [8, 0], sizes = [1, 32], strides = [1, 1]} : vector<17x128xf32> to vector<1x32xf32>
    %122 = vector.broadcast %121 : vector<1x32xf32> to vector<16x32xf32>
    %123 = arith.addf %120, %122 : vector<16x32xf32>
    %c0_34 = arith.constant 0 : index
    %c0_35 = arith.constant 0 : index
    %124 = vector.load %arg1[%c0_34, %c0_35] : memref<32x32xf32, #tpu.memory_space<vmem>>, vector<32x32xf32>
    %125 = arith.truncf %124 : vector<32x32xf32> to vector<32x32xbf16>
    %c0_36 = arith.constant 0 : index
    %c0_37 = arith.constant 0 : index
    %126 = vector.load %arg7[%c0_36, %c0_37] : memref<32x64xbf16, #tpu.memory_space<vmem>>, vector<32x64xbf16>
    %cst_38 = arith.constant dense<0.000000e+00> : vector<32x64xf32>
    %127 = tpu.matmul %125, %126, %cst_38 {dimension_numbers = #tpu.dot_dimension_numbers<[1], [0], [0], [1], [0, 0, 1, 1], [], []>} : vector<32x32xbf16>, vector<32x64xbf16>, vector<32x64xf32> -> vector<32x64xf32>
    %128 = vector.extract_strided_slice %0 {offsets = [9, 0], sizes = [1, 64], strides = [1, 1]} : vector<17x128xf32> to vector<1x64xf32>
    %129 = vector.broadcast %128 : vector<1x64xf32> to vector<32x64xf32>
    %130 = arith.addf %127, %129 : vector<32x64xf32>
    %c0_39 = arith.constant 0 : index
    %c0_40 = arith.constant 0 : index
    %131 = vector.load %arg5[%c0_39, %c0_40] : memref<128x32xf32, #tpu.memory_space<vmem>>, vector<128x32xf32>
    %132 = vector.extract_strided_slice %130 {offsets = [0, 0], sizes = [32, 32], strides = [1, 1]} : vector<32x64xf32> to vector<32x32xf32>
    %133 = tpu.concatenate %132, %132, %132, %132 in 0 : vector<32x32xf32>, vector<32x32xf32>, vector<32x32xf32>, vector<32x32xf32> -> vector<128x32xf32>
    %134 = arith.mulf %133, %131 : vector<128x32xf32>
    %135 = arith.truncf %134 : vector<128x32xf32> to vector<128x32xbf16>
    %136 = vector.extract_strided_slice %130 {offsets = [0, 32], sizes = [32, 32], strides = [1, 1]} : vector<32x64xf32> to vector<32x32xf32>
    %137 = tpu.concatenate %136, %136, %136, %136 in 0 : vector<32x32xf32>, vector<32x32xf32>, vector<32x32xf32>, vector<32x32xf32> -> vector<128x32xf32>
    %138 = arith.mulf %137, %131 : vector<128x32xf32>
    %139 = arith.truncf %138 : vector<128x32xf32> to vector<128x32xbf16>
    %c0_41 = arith.constant 0 : index
    %c0_42 = arith.constant 0 : index
    %140 = vector.load %arg3[%c0_41, %c0_42] : memref<16x128xf32, #tpu.memory_space<vmem>>, vector<16x128xf32>
    %c2 = arith.constant 2 : index
    %c0_43 = arith.constant 0 : index
    %c0_44 = arith.constant 0 : index
    %141 = vector.load %arg8[%c2, %c0_43, %c0_44] : memref<3x32x32xbf16, #tpu.memory_space<vmem>>, vector<1x32x32xbf16>
    %142 = vector.shape_cast %141 : vector<1x32x32xbf16> to vector<32x32xbf16>
    %143 = vector.extract_strided_slice %0 {offsets = [10, 0], sizes = [1, 32], strides = [1, 1]} : vector<17x128xf32> to vector<1x32xf32>
    %144 = arith.truncf %123 : vector<16x32xf32> to vector<16x32xbf16>
    %cst_45 = arith.constant dense<0.000000e+00> : vector<16x128xf32>
    %145 = tpu.matmul %144, %135, %cst_45 {dimension_numbers = #tpu.dot_dimension_numbers<[1], [1], [0], [0], [0, 0, 1, 0], [], []>} : vector<16x32xbf16>, vector<128x32xbf16>, vector<16x128xf32> -> vector<16x128xf32>
    %cst_46 = arith.constant 0.353553385 : f32
    %146 = vector.broadcast %cst_46 : f32 to vector<16x128xf32>
    %147 = arith.mulf %145, %146 : vector<16x128xf32>
    %148 = arith.addf %147, %140 : vector<16x128xf32>
    %cst_47 = arith.constant dense<0xFF800000> : vector<16xf32>
    %149 = vector.multi_reduction <maximumf>, %148, %cst_47 [1] : vector<16x128xf32> to vector<16xf32>
    %150 = vector.shape_cast %149 : vector<16xf32> to vector<16x1xf32>
    %151 = vector.broadcast %150 : vector<16x1xf32> to vector<16x128xf32>
    %152 = arith.subf %148, %151 : vector<16x128xf32>
    %153 = math.exp %152 : vector<16x128xf32>
    %154 = arith.truncf %153 : vector<16x128xf32> to vector<16x128xbf16>
    %cst_48 = arith.constant dense<0.000000e+00> : vector<16x32xf32>
    %155 = tpu.matmul %154, %139, %cst_48 {dimension_numbers = #tpu.dot_dimension_numbers<[1], [0], [0], [1], [0, 0, 1, 1], [], []>} : vector<16x128xbf16>, vector<128x32xbf16>, vector<16x32xf32> -> vector<16x32xf32>
    %156 = vector.extract_strided_slice %153 {offsets = [0, 0], sizes = [16, 32], strides = [1, 1]} : vector<16x128xf32> to vector<16x32xf32>
    %cst_49 = arith.constant dense<0.000000e+00> : vector<16xf32>
    %157 = vector.multi_reduction <add>, %156, %cst_49 [1] : vector<16x32xf32> to vector<16xf32>
    %158 = vector.shape_cast %157 : vector<16xf32> to vector<16x1xf32>
    %159 = vector.extract_strided_slice %1 {offsets = [0, 0], sizes = [1, 32], strides = [1, 1]} : vector<4x32xf32> to vector<1x32xf32>
    %160 = vector.broadcast %158 : vector<16x1xf32> to vector<16x32xf32>
    %161 = vector.broadcast %159 : vector<1x32xf32> to vector<16x32xf32>
    %162 = arith.mulf %160, %161 : vector<16x32xf32>
    %163 = vector.extract_strided_slice %153 {offsets = [0, 32], sizes = [16, 32], strides = [1, 1]} : vector<16x128xf32> to vector<16x32xf32>
    %cst_50 = arith.constant dense<0.000000e+00> : vector<16xf32>
    %164 = vector.multi_reduction <add>, %163, %cst_50 [1] : vector<16x32xf32> to vector<16xf32>
    %165 = vector.shape_cast %164 : vector<16xf32> to vector<16x1xf32>
    %166 = vector.extract_strided_slice %1 {offsets = [1, 0], sizes = [1, 32], strides = [1, 1]} : vector<4x32xf32> to vector<1x32xf32>
    %167 = vector.broadcast %165 : vector<16x1xf32> to vector<16x32xf32>
    %168 = vector.broadcast %166 : vector<1x32xf32> to vector<16x32xf32>
    %169 = arith.mulf %167, %168 : vector<16x32xf32>
    %170 = arith.addf %162, %169 : vector<16x32xf32>
    %171 = vector.extract_strided_slice %153 {offsets = [0, 64], sizes = [16, 32], strides = [1, 1]} : vector<16x128xf32> to vector<16x32xf32>
    %cst_51 = arith.constant dense<0.000000e+00> : vector<16xf32>
    %172 = vector.multi_reduction <add>, %171, %cst_51 [1] : vector<16x32xf32> to vector<16xf32>
    %173 = vector.shape_cast %172 : vector<16xf32> to vector<16x1xf32>
    %174 = vector.extract_strided_slice %1 {offsets = [2, 0], sizes = [1, 32], strides = [1, 1]} : vector<4x32xf32> to vector<1x32xf32>
    %175 = vector.broadcast %173 : vector<16x1xf32> to vector<16x32xf32>
    %176 = vector.broadcast %174 : vector<1x32xf32> to vector<16x32xf32>
    %177 = arith.mulf %175, %176 : vector<16x32xf32>
    %178 = arith.addf %170, %177 : vector<16x32xf32>
    %179 = vector.extract_strided_slice %153 {offsets = [0, 96], sizes = [16, 32], strides = [1, 1]} : vector<16x128xf32> to vector<16x32xf32>
    %cst_52 = arith.constant dense<0.000000e+00> : vector<16xf32>
    %180 = vector.multi_reduction <add>, %179, %cst_52 [1] : vector<16x32xf32> to vector<16xf32>
    %181 = vector.shape_cast %180 : vector<16xf32> to vector<16x1xf32>
    %182 = vector.extract_strided_slice %1 {offsets = [3, 0], sizes = [1, 32], strides = [1, 1]} : vector<4x32xf32> to vector<1x32xf32>
    %183 = vector.broadcast %181 : vector<16x1xf32> to vector<16x32xf32>
    %184 = vector.broadcast %182 : vector<1x32xf32> to vector<16x32xf32>
    %185 = arith.mulf %183, %184 : vector<16x32xf32>
    %186 = arith.addf %178, %185 : vector<16x32xf32>
    %187 = tpu.reciprocal %186 {approx = true} : vector<16x32xf32> -> vector<16x32xf32>
    %188 = arith.mulf %155, %187 : vector<16x32xf32>
    %189 = arith.truncf %188 : vector<16x32xf32> to vector<16x32xbf16>
    %cst_53 = arith.constant dense<0.000000e+00> : vector<16x32xf32>
    %190 = tpu.matmul %189, %142, %cst_53 {dimension_numbers = #tpu.dot_dimension_numbers<[1], [0], [0], [1], [0, 0, 1, 1], [], []>} : vector<16x32xbf16>, vector<32x32xbf16>, vector<16x32xf32> -> vector<16x32xf32>
    %191 = vector.broadcast %143 : vector<1x32xf32> to vector<16x32xf32>
    %192 = arith.addf %190, %191 : vector<16x32xf32>
    %193 = arith.addf %94, %192 : vector<16x32xf32>
    %194 = vector.extract_strided_slice %0 {offsets = [4, 0], sizes = [1, 32], strides = [1, 1]} : vector<17x128xf32> to vector<1x32xf32>
    %195 = vector.extract_strided_slice %0 {offsets = [5, 0], sizes = [1, 32], strides = [1, 1]} : vector<17x128xf32> to vector<1x32xf32>
    %cst_54 = arith.constant dense<0.000000e+00> : vector<16xf32>
    %196 = vector.multi_reduction <add>, %193, %cst_54 [1] : vector<16x32xf32> to vector<16xf32>
    %197 = vector.shape_cast %196 : vector<16xf32> to vector<16x1xf32>
    %cst_55 = arith.constant 3.200000e+01 : f32
    %198 = vector.broadcast %cst_55 : f32 to vector<16x1xf32>
    %199 = arith.divf %197, %198 : vector<16x1xf32>
    %200 = vector.broadcast %199 : vector<16x1xf32> to vector<16x32xf32>
    %201 = arith.subf %193, %200 : vector<16x32xf32>
    %202 = arith.mulf %201, %201 : vector<16x32xf32>
    %cst_56 = arith.constant dense<0.000000e+00> : vector<16xf32>
    %203 = vector.multi_reduction <add>, %202, %cst_56 [1] : vector<16x32xf32> to vector<16xf32>
    %204 = vector.shape_cast %203 : vector<16xf32> to vector<16x1xf32>
    %cst_57 = arith.constant 3.200000e+01 : f32
    %205 = vector.broadcast %cst_57 : f32 to vector<16x1xf32>
    %206 = arith.divf %204, %205 : vector<16x1xf32>
    %cst_58 = arith.constant 9.99999974E-6 : f32
    %207 = vector.broadcast %cst_58 : f32 to vector<16x1xf32>
    %208 = arith.addf %206, %207 : vector<16x1xf32>
    %209 = math.rsqrt %208 : vector<16x1xf32>
    %210 = vector.broadcast %209 : vector<16x1xf32> to vector<16x32xf32>
    %211 = arith.mulf %201, %210 : vector<16x32xf32>
    %212 = vector.broadcast %194 : vector<1x32xf32> to vector<16x32xf32>
    %213 = arith.mulf %211, %212 : vector<16x32xf32>
    %214 = vector.broadcast %195 : vector<1x32xf32> to vector<16x32xf32>
    %215 = arith.addf %213, %214 : vector<16x32xf32>
    %216 = arith.truncf %215 : vector<16x32xf32> to vector<16x32xbf16>
    %c0_59 = arith.constant 0 : index
    %c0_60 = arith.constant 0 : index
    %217 = vector.load %arg9[%c0_59, %c0_60] : memref<32x128xbf16, #tpu.memory_space<vmem>>, vector<32x128xbf16>
    %cst_61 = arith.constant dense<0.000000e+00> : vector<16x128xf32>
    %218 = tpu.matmul %216, %217, %cst_61 {dimension_numbers = #tpu.dot_dimension_numbers<[1], [0], [0], [1], [0, 0, 1, 1], [], []>} : vector<16x32xbf16>, vector<32x128xbf16>, vector<16x128xf32> -> vector<16x128xf32>
    %219 = vector.extract_strided_slice %0 {offsets = [11, 0], sizes = [1, 128], strides = [1, 1]} : vector<17x128xf32> to vector<1x128xf32>
    %220 = vector.broadcast %219 : vector<1x128xf32> to vector<16x128xf32>
    %221 = arith.addf %218, %220 : vector<16x128xf32>
    %222 = arith.mulf %221, %221 : vector<16x128xf32>
    %223 = arith.mulf %221, %222 : vector<16x128xf32>
    %cst_62 = arith.constant 4.471500e-02 : f32
    %224 = vector.broadcast %cst_62 : f32 to vector<16x128xf32>
    %225 = arith.mulf %224, %223 : vector<16x128xf32>
    %226 = arith.addf %221, %225 : vector<16x128xf32>
    %cst_63 = arith.constant 0.797884583 : f32
    %227 = vector.broadcast %cst_63 : f32 to vector<16x128xf32>
    %228 = arith.mulf %227, %226 : vector<16x128xf32>
    %229 = math.tanh %228 : vector<16x128xf32>
    %cst_64 = arith.constant 1.000000e+00 : f32
    %230 = vector.broadcast %cst_64 : f32 to vector<16x128xf32>
    %231 = arith.addf %230, %229 : vector<16x128xf32>
    %cst_65 = arith.constant 5.000000e-01 : f32
    %232 = vector.broadcast %cst_65 : f32 to vector<16x128xf32>
    %233 = arith.mulf %232, %231 : vector<16x128xf32>
    %234 = arith.mulf %221, %233 : vector<16x128xf32>
    %235 = arith.truncf %234 : vector<16x128xf32> to vector<16x128xbf16>
    %c0_66 = arith.constant 0 : index
    %c0_67 = arith.constant 0 : index
    %236 = vector.load %arg10[%c0_66, %c0_67] : memref<128x32xbf16, #tpu.memory_space<vmem>>, vector<128x32xbf16>
    %cst_68 = arith.constant dense<0.000000e+00> : vector<16x32xf32>
    %237 = tpu.matmul %235, %236, %cst_68 {dimension_numbers = #tpu.dot_dimension_numbers<[1], [0], [0], [1], [0, 0, 1, 1], [], []>} : vector<16x128xbf16>, vector<128x32xbf16>, vector<16x32xf32> -> vector<16x32xf32>
    %238 = vector.extract_strided_slice %0 {offsets = [12, 0], sizes = [1, 32], strides = [1, 1]} : vector<17x128xf32> to vector<1x32xf32>
    %239 = vector.broadcast %238 : vector<1x32xf32> to vector<16x32xf32>
    %240 = arith.addf %237, %239 : vector<16x32xf32>
    %241 = arith.addf %193, %240 : vector<16x32xf32>
    %c0_69 = arith.constant 0 : index
    %c0_70 = arith.constant 0 : index
    %242 = vector.load %arg12[%c0_69, %c0_70] : memref<16x32xf32, #tpu.memory_space<vmem>>, vector<16x32xf32>
    tpu.vector_store %arg12[%c0_69, %c0_70], %241 {strides = array<i32>} : memref<16x32xf32, #tpu.memory_space<vmem>>, vector<16x32xf32>,
    return
  }
}

</mosaic_0001>

<bundles_post_ra>
// kernel: tile.9
= control target key start
LH: loop header
LB: loop body
LE: loop exit
PB: predicated region body
PF: predicated region fallthrough
CT: control target
= control target key end

     0   :  { %vm83_vm0 = vcmask 1047556   ;;  %vm85_vm1 = vcmask 130048   ;;  %s196_s9 = smov 48   ;;  %s197_s14 = smov 16   ;;  %vm104_vm2 = vcmask 523648   ;;  %vm125_vm3 = vcmask 392448   ;;  %s290_s0 = inlined_call_operand.vmem [shape: f32[16,4,16], index: 0, kind: input, shape index: {}]   ;;  %s291_s1 = inlined_call_operand.vmem [shape: f32[16,64], index: 1, kind: output, shape index: {}]  }
   0x1   :  { %v181_v0 = vld [vmem:[%s290_s0 + $0x1c] sm:$0xf]  ;;  %v182_v1 = vld [vmem:[%s290_s0 + $0x18] sm:$0xf]  ;;  %v183_v2 = vld [vmem:[%s290_s0 + $0x14] sm:$0xf] }
   0x2   :  { %49 = vst [vmem:[#allocation0 + $0x38] sm:$0xf] %v181_v0  ;;  %54 = vst [vmem:[#allocation0 + $0x30] sm:$0xf] %v182_v1  ;;  %v184_v3 = vld [vmem:[%s290_s0 + $0x10] sm:$0xf] }
   0x3   :  { %59 = vst [vmem:[#allocation0 + $0x28] sm:$0xf] %v183_v2  ;;  %v185_v4 = vld [vmem:[%s290_s0 + $0xc] sm:$0xf]  ;;  %v186_v5 = vld [vmem:[%s290_s0 + $0x8] sm:$0xf] }
   0x4   :  { %64 = vst [vmem:[#allocation0 + $0x20] sm:$0xf] %v184_v3  ;;  %69 = vst [vmem:[#allocation0 + $0x18] sm:$0xf] %v185_v4  ;;  %v187_v6 = vld [vmem:[%s290_s0 + $0x4] sm:$0xf] }
   0x5   :  { %74 = vst [vmem:[#allocation0 + $0x10] sm:$0xf] %v186_v5  ;;  %v79_v7 = vld [vmem:[%s290_s0] sm:$0xf]  ;;  %78 = vst [vmem:[#allocation0 + $0x8] sm:$0xf] %v187_v6 }
   0x6   :  { %80 = vst [vmem:[#allocation0] sm:$0xf] %v79_v7  ;;  %v173_v8 = vld [vmem:[%s290_s0 + $0x3c] sm:$0xf]  ;;  %v174_v9 = vld [vmem:[%s290_s0 + $0x38] sm:$0xf] }
   0x7   :  { %9 = vst [vmem:[#allocation0 + $0x78] sm:$0xf] %v173_v8  ;;  %14 = vst [vmem:[#allocation0 + $0x70] sm:$0xf] %v174_v9  ;;  %v175_v10 = vld [vmem:[%s290_s0 + $0x34] sm:$0xf] }
   0x8   :  { %v176_v11 = vld [vmem:[%s290_s0 + $0x30] sm:$0xf]  ;;  %v177_v12 = vld [vmem:[%s290_s0 + $0x2c] sm:$0xf]  ;;  %19 = vst [vmem:[#allocation0 + $0x68] sm:$0xf] %v175_v10 }
   0x9   :  { %24 = vst [vmem:[#allocation0 + $0x60] sm:$0xf] %v176_v11  ;;  %29 = vst [vmem:[#allocation0 + $0x58] sm:$0xf] %v177_v12  ;;  %v178_v13 = vld [vmem:[%s290_s0 + $0x28] sm:$0xf] }
   0xa   :  { %v179_v14 = vld [vmem:[%s290_s0 + $0x24] sm:$0xf]  ;;  %v180_v15 = vld [vmem:[%s290_s0 + $0x20] sm:$0xf]  ;;  %34 = vst [vmem:[#allocation0 + $0x50] sm:$0xf] %v178_v13 }
   0xb   :  { %39 = vst [vmem:[#allocation0 + $0x48] sm:$0xf] %v179_v14  ;;  %44 = vst [vmem:[#allocation0 + $0x40] sm:$0xf] %v180_v15  ;;  %s195_s0 = smov 32   ;;  %vm146_vm4 = vcmask 261248  }
   0xc   :  { %v120_v16 = vld [vmem:[#allocation0 + $0x2] ss:$8 sm:$0xf0]   ;;  %v99_v17 = vld [vmem:[#allocation0 + $0x3] ss:$8 sm:$0xf0]  }
   0xd   :  { %v118_v18 = vld [vmem:[#allocation0 + $0x2] ss:$8 sm:$0xf]   ;;  %v97_v19 = vld [vmem:[#allocation0 + $0x3] ss:$8 sm:$0xf]  }
   0xe   :  { %v122_v20 = vsel %vm83_vm0, %v120_v16, %v118_v18  ;;  %v101_v21 = vsel %vm83_vm0, %v99_v17, %v97_v19  ;;  %v139_v24 = vld [vmem:[#allocation0 + $0x1] ss:$8 sm:$0xf]   ;;  %v81_v32 = vld [vmem:[#allocation0] ss:$8 sm:$0xf]  }
   0xf   :  { %123 = vrot.lane.b32.xlu1 %v122_v20, %s195_s0  ;;  %102 = vrot.lane.b32.xlu0 %v101_v21, %s196_s9  ;;  %v141_v25 = vld [vmem:[#allocation0 + $0x1] ss:$8 sm:$0xf0]   ;;  %v82_v33 = vld [vmem:[#allocation0] ss:$8 sm:$0xf0]  }
  0x10   :  { %v130_v22 = vld [vmem:[#allocation0 + $0x42] ss:$8 sm:$0xf0]   ;;  %v109_v23 = vld [vmem:[#allocation0 + $0x43] ss:$8 sm:$0xf0]   ;;  %v84_v34 = vsel %vm83_vm0, %v82_v33, %v81_v32  ;;  %v143_v38 = vsel %vm83_vm0, %v141_v25, %v139_v24 }
  0x11   :  { %v151_v31 = vld [vmem:[#allocation0 + $0x41] ss:$8 sm:$0xf0]   ;;  %v90_v36 = vld [vmem:[#allocation0 + $0x40] ss:$8 sm:$0xf0]  }
  0x12   :  { %v128_v26 = vld [vmem:[#allocation0 + $0x42] ss:$8 sm:$0xf]   ;;  %v107_v27 = vld [vmem:[#allocation0 + $0x43] ss:$8 sm:$0xf]  }
  0x13   :  { %v132_v28 = vsel %vm83_vm0, %v130_v22, %v128_v26  ;;  %v111_v29 = vsel %vm83_vm0, %v109_v23, %v107_v27  ;;  %v149_v30 = vld [vmem:[#allocation0 + $0x41] ss:$8 sm:$0xf]   ;;  %v88_v35 = vld [vmem:[#allocation0 + $0x40] ss:$8 sm:$0xf]  }
  0x14   :  { %133 = vrot.lane.b32.xlu1 %v132_v28, %s195_s0  ;;  %112 = vrot.lane.b32.xlu0 %v111_v29, %s196_s9  ;;  %v153_v37 = vsel %vm83_vm0, %v151_v31, %v149_v30  ;;  %86 = vst.msk [vmem:[%s291_s1] sm:$0xff] %vm85_vm1, %v84_v34   ;;  %v92_v39 = vsel %vm83_vm0, %v90_v36, %v88_v35 }
  0x15   :  { %188 = vst.msk [vmem:[%s291_s1 + $0x8] sm:$0xff] %vm85_vm1, %v92_v39  }
  0x18   :  { %154 = vrot.lane.b32.xlu1 %v153_v37, %s197_s14  ;;  %144 = vrot.lane.b32.xlu0 %v143_v38, %s197_s14 }
  0x81   :  { %v124_v40 = vpop.permute.xlu1 %123   ;;  %v103_v41 = vpop.permute.xlu0 %102  }
  0x82   :  { %105 = vst.msk [vmem:[%s291_s1] sm:$0xff] %vm104_vm2, %v103_v41  }
  0x83   :  { %126 = vst.msk [vmem:[%s291_s1] sm:$0xff] %vm125_vm3, %v124_v40  }
  0x86   :  { %v134_v42 = vpop.permute.xlu1 %133   ;;  %v113_v43 = vpop.permute.xlu0 %112  }
  0x87   :  { %189 = vst.msk [vmem:[%s291_s1 + $0x8] sm:$0xff] %vm104_vm2, %v113_v43  }
  0x88   :  { %190 = vst.msk [vmem:[%s291_s1 + $0x8] sm:$0xff] %vm125_vm3, %v134_v42  }
  0x8a   :  { %v155_v44 = vpop.permute.xlu1 %154   ;;  %v145_v45 = vpop.permute.xlu0 %144  }
  0x8b   :  { %191 = vst.msk [vmem:[%s291_s1 + $0x8] sm:$0xff] %vm146_vm4, %v155_v44   ;;  %147 = vst.msk [vmem:[%s291_s1] sm:$0xff] %vm146_vm4, %v145_v45  }

// kernel: decoder_block.1
= control target key start
LH: loop header
LB: loop body
LE: loop exit
PB: predicated region body
PF: predicated region fallthrough
CT: control target
= control target key end

     0   :  { %17 = vsyncpa [#allocation3], 0  ;;  %s2532_s0 = inlined_call_operand.vmem [shape: f32[16,32], index: 0, kind: input, shape index: {}]   ;;  %s2533_s1 = inlined_call_operand.vmem [shape: f32[32,32], index: 1, kind: input, shape index: {}]   ;;  %s2534_s2 = inlined_call_operand.vmem [shape: f32[16,64], index: 2, kind: input, shape index: {}]   ;;  %s2535_s3 = inlined_call_operand.vmem [shape: f32[16,128], index: 3, kind: input, shape index: {}]   ;;  %s2536_s4 = inlined_call_operand.vmem [shape: f32[64,32], index: 4, kind: input, shape index: {}]   ;;  %s2537_s5 = inlined_call_operand.vmem [shape: f32[128,32], index: 5, kind: input, shape index: {}]   ;;  %s2538_s6 = inlined_call_operand.hbm [shape: bf16[32,96], index: 6, kind: input, shape index: {}]   ;;  %s2539_s7 = inlined_call_operand.hbm [shape: bf16[32,64], index: 7, kind: input, shape index: {}]   ;;  %s2540_s8 = inlined_call_operand.vmem [shape: bf16[3,32,32], index: 8, kind: input, shape index: {}]   ;;  %s2541_s9 = inlined_call_operand.hbm [shape: bf16[32,128], index: 9, kind: input, shape index: {}]   ;;  %s2542_s10 = inlined_call_operand.vmem [shape: bf16[128,32], index: 10, kind: input, shape index: {}]   ;;  %s2543_s11 = inlined_call_operand.vmem [shape: f32[17,128], index: 11, kind: input, shape index: {}]   ;;  %s2544_s12 = inlined_call_operand.hbm [shape: f32[16,32], index: 12, kind: output, shape index: {}]  }
   0x1   :  { %18 = vsyncpa [#allocation6], 0 }
   0x2   :  { %19 = vsyncpa [#allocation4], 0  ;;  %s1812_s21 = smov [#allocation5]   ;;  %s1813_s23 = smov [#allocation2]  }
   0x3   :  { %s49_s22 = sshll.u32 %s1812_s21, 4  ;;  %s37_s24 = sshll.u32 %s1813_s23, 4  ;;  %s50_s22 = int_to_ptr.vmem [resolvable:$true] %s49_s22  ;;  %s38_s24 = int_to_ptr.vmem [resolvable:$true] %s37_s24 }
   0x4   :  { %s1734_s25 = scalar_lea.vmem %s50_s22, 256  ;;  %p1739_p1 = scmp.lt.s32.totalorder %s50_s22, %s50_s22 }
   0x5   :  { %p1735_p0 = scmp.ne.s32.totalorder %s50_s22, %s1734_s25  ;;  %p1740_p2 = scmp.lt.s32.totalorder %s1734_s25, %s1734_s25 }
   0x7   :  { %p1741_p3 = por %p1740_p2, %p1739_p1 }
   0x9   :  { %p1742_p4 = pnand %p1741_p3, %p1735_p0 }
   0xb   :  { %1745 = shalt.err (!%p1742_p4)
}
   0xc   :  { %s1814_s26 = smov 64   ;;  %s1815_s27 = smov 4  }
   0xd   :  { %55 = dma.hbm_to_vmem [thread:$0]  %s2539_s7, 256, %s50_s22, [#allocation6], %s1814_s26, %s1814_s26, %s1815_s27  }
   0xe   :  { %s1754_s30 = scalar_lea.vmem %s38_s24, 256  ;;  %p1759_p6 = scmp.lt.s32.totalorder %s38_s24, %s38_s24 }
   0xf   :  { %p1755_p5 = scmp.ne.s32.totalorder %s38_s24, %s1754_s30  ;;  %p1760_p7 = scmp.lt.s32.totalorder %s1754_s30, %s1754_s30 }
  0x11   :  { %p1761_p8 = por %p1760_p7, %p1759_p6 }
  0x13   :  { %p1762_p9 = pnand %p1761_p8, %p1755_p5 }
  0x15   :  { %1765 = shalt.err (!%p1762_p9)
}
  0x16   :  { %43 = dma.hbm_to_vmem [thread:$0]  %s2538_s6, 256, %s38_s24, [#allocation3], %s1814_s26, %s1814_s26, %s1815_s27  }
  0x17   :  { %s1816_s15 = smov [#allocation7]  }
  0x18   :  { %s63_s16 = sshll.u32 %s1816_s15, 4  ;;  %s64_s16 = int_to_ptr.vmem [resolvable:$true] %s63_s16 }
  0x19   :  { %s1774_s17 = scalar_lea.vmem %s64_s16, 256  ;;  %p1779_p11 = scmp.lt.s32.totalorder %s64_s16, %s64_s16 }
  0x1a   :  { %p1775_p10 = scmp.ne.s32.totalorder %s64_s16, %s1774_s17  ;;  %p1780_p12 = scmp.lt.s32.totalorder %s1774_s17, %s1774_s17 }
  0x1c   :  { %p1781_p13 = por %p1780_p12, %p1779_p11 }
  0x1e   :  { %p1782_p0 = pnand %p1781_p13, %p1775_p10 }
  0x20   :  { %1785 = shalt.err (!%p1782_p0)
}
  0x21   :  { %69 = dma.hbm_to_vmem [thread:$0]  %s2541_s9, 256, %s64_s16, [#allocation6], %s1814_s26, %s1814_s26, %s1815_s27  }
  0x22   :  { %1806 = dma.done.wait [#allocation3], 256  }
  0x23   :  { %1807 = vsyncadd [#allocation3], 4294967040 }
  0x24   :  { %1808 = dma.done.wait [#allocation6], 512  }
  0x25   :  { %1809 = vsyncadd [#allocation6], 4294966784  ;;  %vm89_vm0 = vcmask 261120   ;;  %v1909_v0 = vld [vmem:[%s2532_s0] sm:$0xff]  ;;  %v1914_v1 = vld [vmem:[%s2532_s0 + $0x8] sm:$0xff]  ;;  %v1817_v15 = vmov 0.0   ;;  %v117_v31 = vlaneseq }
  0x26   :  { %v90_v2 = vsel %vm89_vm0, %v1909_v0, 0.0  ;;  %v93_v3 = vsel %vm89_vm0, %v1914_v1, 0.0  ;;  %v1673_v14 = vld [vmem:[#allocation2 + $0x8] sm:$0xff]   ;;  %1527 = vmatprep.subr.bf16.mxu0 %v1817_v15  ;;  %vm1818_vm1 = vmmov 0   ;;  %v1674_v16 = vld [vmem:[#allocation2] sm:$0xff]   ;;  %1535 = vmatprep.subr.bf16.mxu1 %v1817_v15  ;;  %v1935_v17 = vld [vmem:[%s2536_s4 + $0x38] sm:$0xff] }
  0x27   :  { %91 = vadd.xlane.f32.xlu0 %v90_v2  ;;  %1531 = vmatprep.mubr.msk.bf16.mxu0 %vm1818_vm1, %v1817_v15  ;;  %v1940_v18 = vld [vmem:[%s2536_s4 + $0x30] sm:$0xff]  ;;  %s1819_s24 = smov 32   ;;  %v1949_v19 = vld [vmem:[%s2536_s4 + $0x20] sm:$0xff]  ;;  %v1963_v21 = vld [vmem:[%s2536_s4 + $0x28] sm:$0xff]  ;;  %v1988_v32 = vshrl.u32 %v117_v31, 7  ;;  %vm361_vm2 = vcmask 523264  }
  0x28   :  { %1528 = vmatpush3.bf16.msra.mxu0 %v1673_v14  ;;  %1543 = vmatprep.mubr.msk.bf16.mxu1 %vm1818_vm1, %v1817_v15  ;;  %v1954_v20 = vld [vmem:[%s2536_s4 + $0x10] sm:$0xff]  ;;  %v1968_v22 = vld [vmem:[%s2536_s4] sm:$0xff]  ;;  %v1977_v23 = vld [vmem:[%s2536_s4 + $0x18] sm:$0xff]  ;;  %s1822_s22 = smov 80   ;;  %vm435_vm3 = vcmask 130048  }
  0x29   :  { %1529 = vmatprep.subr.bf16.mxu0 %v1817_v15  ;;  %v1984_v24 = vld [vmem:[%s2536_s4 + $0x8] sm:$0xff]  ;;  %v119_v33 = vsub.s32 0, %v1988_v32  ;;  %v1994_v34 = vld [vmem:[%s2543_s11] sm:$0xff]  ;;  %v125_v38 = vsub.s32 1, %v1988_v32  ;;  %v136_v50 = vsub.s32 6, %v1988_v32  ;;  %s1820_s4 = smov 96  }
  0x2b   :  { %94 = vadd.xlane.f32.xlu0 %v93_v3  ;;  %v120_v37 = vrot.slane %v1994_v34, %v119_v33  ;;  %v126_v42 = vrot.slane %v1994_v34, %v125_v38  ;;  %v137_v52 = vrot.slane %v1994_v34, %v136_v50 }
  0x2c   :  { %1530 = vmatpush3.bf16.msra.mxu0 %v1674_v16 }
  0x2d   :  { %1547 = vmatprep.subr.bf16.mxu0 %v1817_v15 }
  0x41   :  { %222 = vrot.lane.b32.xlu0 %v1940_v18, %s1819_s24 }
  0x45   :  { %214 = vrot.lane.b32.xlu0 %v1954_v20, %s1819_s24 }
  0x49   :  { %210 = vrot.lane.b32.xlu0 %v1968_v22, %s1819_s24 }
  0xb0   :  { %v92_v4 = vpop.xlane.xlu0 %91 }
  0xb1   :  { %v97_v5 = vmul.f32 0.03125, %v92_v4 }
  0xb3   :  { %v99_v6 = vsub.f32 %v1909_v0, %v97_v5 }
  0xb4   :  { %v95_v7 = vpop.xlane.xlu0 %94 }
  0xb5   :  { %v98_v8 = vmul.f32 0.03125, %v95_v7  ;;  %v101_v9 = vmul.f32 %v99_v6, %v99_v6 }
  0xb7   :  { %v100_v10 = vsub.f32 %v1914_v1, %v98_v8  ;;  %v103_v11 = vsel %vm89_vm0, %v101_v9, 0.0 }
  0xb8   :  { %104 = vadd.xlane.f32.xlu1 %v103_v11  ;;  %v223_v51 = vpop.permute.xlu0 %222 }
  0xb9   :  { %v102_v12 = vmul.f32 %v100_v10, %v100_v10 }
  0xbb   :  { %v106_v13 = vsel %vm89_vm0, %v102_v12, 0.0 }
  0xbc   :  { %107 = vadd.xlane.f32.xlu1 %v106_v13  ;;  %v215_v55 = vpop.permute.xlu0 %214 }
  0xc0   :  { %v211_v4 = vpop.permute.xlu0 %210 }
  0xcd   :  { %224 = vrot.lane.b32.xlu1 %v1935_v17, %s1819_s24 }
  0xd1   :  { %218 = vrot.lane.b32.xlu1 %v1949_v19, %s1819_s24 }
  0xd5   :  { %220 = vrot.lane.b32.xlu1 %v1963_v21, %s1819_s24 }
  0xd9   :  { %216 = vrot.lane.b32.xlu1 %v1977_v23, %s1819_s24 }
  0xdd   :  { %212 = vrot.lane.b32.xlu1 %v1984_v24, %s1819_s24 }
 0x141   :  { %v105_v25 = vpop.xlane.xlu1 %104 }
 0x142   :  { %v109_v26 = vmul.f32 0.03125, %v105_v25 }
 0x144   :  { %v111_v27 = vadd.f32 1e-05, %v109_v26 }
 0x145   :  { %v108_v28 = vpop.xlane.xlu1 %107 }
 0x146   :  { %1693 = vrsqrt.f32 %v111_v27  ;;  %v110_v29 = vmul.f32 0.03125, %v108_v28 }
 0x148   :  { %v112_v30 = vadd.f32 1e-05, %v110_v29 }
 0x149   :  { %v225_v47 = vpop.permute.xlu1 %224 }
 0x14a   :  { %1695 = vrsqrt.f32 %v112_v30 }
 0x14d   :  { %v219_v48 = vpop.permute.xlu1 %218 }
 0x151   :  { %v221_v49 = vpop.permute.xlu1 %220 }
 0x153   :  { %v1694_v35 = vpop.eup %1693 }
 0x154   :  { %v115_v36 = vmul.f32 %v1694_v35, %v99_v6 }
 0x155   :  { %v217_v54 = vpop.permute.xlu1 %216 }
 0x156   :  { %v121_v41 = vmul.f32 %v120_v37, %v115_v36 }
 0x157   :  { %v1696_v39 = vpop.eup %1695 }
 0x158   :  { %v116_v40 = vmul.f32 %v1696_v39, %v100_v10  ;;  %v127_v44 = vadd.f32 %v126_v42, %v121_v41 }
 0x159   :  { %v213_v60 = vpop.permute.xlu1 %212 }
 0x15a   :  { %v122_v43 = vmul.f32 %v120_v37, %v116_v40 }
 0x15c   :  { %v128_v45 = vadd.f32 %v126_v42, %v122_v43 }
 0x15e   :  { %v129_v46 = vpack.c.bf16 %v128_v45, %v127_v44 }
 0x160   :  { %1532 = vmatmul.mubr.msk.bf16.vlgmr.msra.gmra.mxu0 %vm89_vm0, %v129_v46 }
 0x161   :  { %1555 = vmatprep.mubr.msk.bf16.mxu0 %vm1818_vm1, %v1817_v15 }
 0x220   :  { %v187_v53 = vpop.f32.mrf.mxu0 }
 0x221   :  { %v2010_v57 = vadd.f32 %v187_v53, %v137_v52  ;;  %v283_v53 = vld [vmem:[%s2534_s2 + $0x8] sm:$0xff] }
 0x222   :  { %v1533_v56 = vpop.f32.mrf.mxu0 }
 0x223   :  { %v240_v62 = vmul.f32 %v223_v51, %v2010_v57  ;;  %v238_v2 = vmul.f32 %v219_v48, %v2010_v57  ;;  %v234_v9 = vmul.f32 %v211_v4, %v2010_v57  ;;  %v236_v10 = vmul.f32 %v215_v55, %v2010_v57 }
 0x224   :  { %v190_v58 = vpop.f32.mrf.mxu0 }
 0x225   :  { %v2012_v59 = vadd.f32 %v190_v58, %v137_v52 }
 0x226   :  { %v1534_v61 = vpop.f32.mrf.mxu0 }
 0x227   :  { %v241_v63 = vmul.f32 %v225_v47, %v2012_v59  ;;  %v239_v3 = vmul.f32 %v221_v49, %v2012_v59  ;;  %v235_v5 = vmul.f32 %v213_v60, %v2012_v59  ;;  %v237_v8 = vmul.f32 %v217_v54, %v2012_v59  ;;  %v282_v47 = vld [vmem:[%s2534_s2] sm:$0xff]  ;;  %s1821_s2 = smov 112  }
 0x228   :  { %v288_v41 = vpack.c.bf16 %v2012_v59, %v2010_v57 }
 0x229   :  { %v245_v6 = vpack.c.bf16 %v241_v63, %v240_v62  ;;  %v244_v7 = vpack.c.bf16 %v239_v3, %v238_v2  ;;  %v242_v11 = vpack.c.bf16 %v235_v5, %v234_v9  ;;  %v243_v12 = vpack.c.bf16 %v237_v8, %v236_v10 }
 0x22b   :  { %299 = vrot.lane.b32.xlu0 %v245_v6, %s1820_s4  ;;  %297 = vrot.lane.b32.xlu1 %v244_v7, %s1820_s4 }
 0x22f   :  { %295 = vrot.lane.b32.xlu0 %v243_v12, %s1820_s4  ;;  %293 = vrot.lane.b32.xlu1 %v242_v11, %s1820_s4 }
 0x233   :  { %258 = vrot.lane.b32.xlu0 %v1940_v18, %s1814_s26  ;;  %260 = vrot.lane.b32.xlu1 %v1935_v17, %s1814_s26 }
 0x237   :  { %254 = vrot.lane.b32.xlu0 %v1949_v19, %s1814_s26  ;;  %256 = vrot.lane.b32.xlu1 %v1963_v21, %s1814_s26 }
 0x23b   :  { %250 = vrot.lane.b32.xlu0 %v1954_v20, %s1814_s26  ;;  %252 = vrot.lane.b32.xlu1 %v1977_v23, %s1814_s26 }
 0x23f   :  { %246 = vrot.lane.b32.xlu0 %v1968_v22, %s1814_s26  ;;  %248 = vrot.lane.b32.xlu1 %v1984_v24, %s1814_s26 }
 0x29d   :  { %v300_v13 = vpop.permute.xlu0 %299  ;;  %v298_v14 = vpop.permute.xlu1 %297 }
 0x29e   :  { %v314_v16 = vsel %vm89_vm0, %v300_v13, 0  ;;  %v311_v21 = vsel %vm89_vm0, %v298_v14, 0 }
 0x29f   :  { %1536 = vmatpush3.bf16.xpose.msra.mxu1 %v314_v16 }
 0x2a0   :  { %1537 = vmatprep.subr.bf16.mxu1 %v1817_v15 }
 0x2a1   :  { %v296_v17 = vpop.permute.xlu0 %295  ;;  %v294_v18 = vpop.permute.xlu1 %293 }
 0x2a2   :  { %v308_v35 = vsel %vm89_vm0, %v296_v17, 0  ;;  %v305_v40 = vsel %vm89_vm0, %v294_v18, 0 }
 0x2a5   :  { %v259_v19 = vpop.permute.xlu0 %258  ;;  %v261_v20 = vpop.permute.xlu1 %260 }
 0x2a6   :  { %v276_v23 = vmul.f32 %v259_v19, %v2010_v57  ;;  %v277_v22 = vmul.f32 %v261_v20, %v2012_v59 }
 0x2a7   :  { %1538 = vmatpush3.bf16.xpose.msra.mxu1 %v311_v21 }
 0x2a8   :  { %v281_v25 = vpack.c.bf16 %v277_v22, %v276_v23  ;;  %1539 = vmatprep.subr.bf16.mxu1 %v1817_v15 }
 0x2a9   :  { %v255_v24 = vpop.permute.xlu0 %254  ;;  %v257_v26 = vpop.permute.xlu1 %256 }
 0x2aa   :  { %v274_v27 = vmul.f32 %v255_v24, %v2010_v57  ;;  %v275_v28 = vmul.f32 %v257_v26, %v2012_v59  ;;  %385 = vrot.lane.b32.xlu0 %v281_v25, %s1814_s26  ;;  %v1675_v26 = vld [vmem:[%s2540_s8 + $0x8] sm:$0xff]  }
 0x2ac   :  { %v280_v29 = vpack.c.bf16 %v275_v28, %v274_v27  ;;  %v1676_v27 = vld [vmem:[%s2540_s8] sm:$0xff]  }
 0x2ad   :  { %v251_v30 = vpop.permute.xlu0 %250  ;;  %v253_v31 = vpop.permute.xlu1 %252 }
 0x2ae   :  { %v272_v36 = vmul.f32 %v251_v30, %v2010_v57  ;;  %v273_v37 = vmul.f32 %v253_v31, %v2012_v59  ;;  %383 = vrot.lane.b32.xlu1 %v280_v29, %s1814_s26 }
 0x2af   :  { %1540 = vmatpush3.bf16.xpose.msra.mxu1 %v308_v35 }
 0x2b0   :  { %1541 = vmatprep.subr.bf16.mxu1 %v1817_v15  ;;  %v279_v39 = vpack.c.bf16 %v273_v37, %v272_v36  ;;  %v444_v37 = vsub.s32 5, %v1988_v32 }
 0x2b1   :  { %v247_v42 = vpop.permute.xlu0 %246  ;;  %v249_v43 = vpop.permute.xlu1 %248 }
 0x2b2   :  { %v270_v61 = vmul.f32 %v247_v42, %v2010_v57  ;;  %v271_v62 = vmul.f32 %v249_v43, %v2012_v59 }
 0x2b4   :  { %v278_v63 = vpack.c.bf16 %v271_v62, %v270_v61 }
 0x2b7   :  { %1542 = vmatpush3.bf16.xpose.msra.mxu1 %v305_v40  ;;  %v2105_v40 = vld [vmem:[%s2543_s11 + $0x8] sm:$0xff] }
 0x2b8   :  { %1603 = vmatprep.subr.bf16.mxu1 %v1817_v15 }
 0x2be   :  { %1544 = vmatmul.mubr.msk.bf16.vlgmr.msra.gmra.mxu1 %vm89_vm0, %v288_v41  ;;  %v2110_v41 = vrot.slane %v2105_v40, %v136_v50 }
 0x2bf   :  { %1619 = vmatprep.mubr.msk.bf16.mxu1 %vm1818_vm1, %v1817_v15 }
 0x31c   :  { %v386_v44 = vpop.permute.xlu0 %385 }
 0x31d   :  { %1548 = vmatpush3.bf16.msra.mxu0 %v386_v44  ;;  %v2115_v44 = vrot.slane %v2105_v40, %v444_v37 }
 0x31e   :  { %1549 = vmatprep.subr.bf16.mxu0 %v1817_v15 }
 0x320   :  { %v384_v45 = vpop.permute.xlu1 %383 }
 0x321   :  { %1550 = vmatpush3.bf16.msra.mxu0 %v384_v45 }
 0x322   :  { %1551 = vmatprep.subr.bf16.mxu0 %v1817_v15 }
 0x37e   :  { %v350_v46 = vpop.f32.mrf.mxu1 }
 0x37f   :  { %v357_v48 = vmul.f32 0.35355338, %v350_v46 }
 0x380   :  { %v1545_v49 = vpop.f32.mrf.mxu1 }
 0x381   :  { %v359_v51 = vadd.f32 %v357_v48, %v282_v47 }
 0x382   :  { %v353_v52 = vpop.f32.mrf.mxu1 }
 0x383   :  { %v358_v54 = vmul.f32 0.35355338, %v353_v52  ;;  %v362_v55 = vsel %vm361_vm2, %v359_v51, -inf }
 0x384   :  { %v1546_v56 = vpop.f32.mrf.mxu1  ;;  %363 = vmax.xlane.f32.xlu0 %v362_v55 }
 0x385   :  { %v360_v58 = vadd.f32 %v358_v54, %v283_v53  ;;  %v2128_v53 = vld [vmem:[%s2543_s11 + $0x10] ss:$0 sm:$0xff] }
 0x387   :  { %v365_v60 = vsel %vm361_vm2, %v360_v58, -inf }
 0x388   :  { %366 = vmax.xlane.f32.xlu1 %v365_v60 }
 0x399   :  { %379 = vrot.lane.b32.xlu1 %v278_v63, %s1814_s26 }
 0x39a   :  { %381 = vrot.lane.b32.xlu0 %v279_v39, %s1814_s26  ;;  %v484_v39 = vsub.s32 7, %v1988_v32 }
 0x39c   :  { %v2118_v45 = vrot.slane %v2105_v40, %v484_v39 }
 0x40d   :  { %v364_v2 = vpop.xlane.xlu0 %363 }
 0x40e   :  { %v368_v3 = vsub.f32 %v359_v51, %v364_v2 }
 0x410   :  { %v370_v4 = vmul.f32 1.442695, %v368_v3 }
 0x411   :  { %v382_v5 = vpop.permute.xlu0 %381  ;;  %v367_v6 = vpop.xlane.xlu1 %366 }
 0x412   :  { %1697 = vpow2.f32 %v370_v4  ;;  %v369_v7 = vsub.f32 %v360_v58, %v367_v6  ;;  %1552 = vmatpush3.bf16.msra.mxu0 %v382_v5 }
 0x413   :  { %1553 = vmatprep.subr.bf16.mxu0 %v1817_v15 }
 0x414   :  { %v372_v8 = vmul.f32 1.442695, %v369_v7 }
 0x415   :  { %v380_v9 = vpop.permute.xlu1 %379 }
 0x416   :  { %1699 = vpow2.f32 %v372_v8  ;;  %1554 = vmatpush3.bf16.msra.mxu0 %v380_v9 }
 0x417   :  { %1559 = vmatprep.subr.bf16.mxu0 %v1817_v15 }
 0x41f   :  { %v1698_v57 = vpop.eup %1697 }
 0x420   :  { %450 = vrot.lane.b32.xlu0 %v1698_v57, %s1821_s2  ;;  %v436_v11 = vsel %vm435_vm3, %v1698_v57, 0.0 }
 0x423   :  { %v1700_v59 = vpop.eup %1699 }
 0x424   :  { %470 = vrot.lane.b32.xlu0 %v1698_v57, %s1820_s4  ;;  %452 = vrot.lane.b32.xlu1 %v1700_v59, %s1821_s2  ;;  %v374_v10 = vpack.c.bf16 %v1700_v59, %v1698_v57  ;;  %v439_v12 = vsel %vm435_vm3, %v1700_v59, 0.0 }
 0x426   :  { %1556 = vmatmul.mubr.msk.bf16.vlgmr.msra.gmra.mxu0 %vm361_vm2, %v374_v10 }
 0x427   :  { %1563 = vmatprep.mubr.msk.bf16.mxu0 %vm1818_vm1, %v1817_v15  ;;  %1560 = vmatpush3.bf16.msra.mxu0 %v1675_v26 }
 0x428   :  { %490 = vrot.lane.b32.xlu0 %v1698_v57, %s1822_s22  ;;  %472 = vrot.lane.b32.xlu1 %v1700_v59, %s1820_s4  ;;  %v518_v57 = vrot.slane %v1994_v34, %v484_v39  ;;  %v2180_v39 = vld [vmem:[%s2537_s5 + $0x50] sm:$0xff] }
 0x429   :  { %1561 = vmatprep.subr.bf16.mxu0 %v1817_v15 }
 0x42b   :  { %1562 = vmatpush3.bf16.msra.mxu0 %v1676_v27 }
 0x42c   :  { %492 = vrot.lane.b32.xlu1 %v1700_v59, %s1822_s22  ;;  %1567 = vmatprep.subr.bf16.mxu0 %v1817_v15 }
 0x447   :  { %437 = vadd.xlane.f32.xlu0 %v436_v11 }
 0x450   :  { %440 = vadd.xlane.f32.xlu1 %v439_v12 }
 0x492   :  { %v451_v13 = vpop.permute.xlu0 %450 }
 0x493   :  { %v456_v14 = vsel %vm435_vm3, %v451_v13, 0.0 }
 0x494   :  { %457 = vadd.xlane.f32.xlu0 %v456_v14 }
 0x496   :  { %v471_v16 = vpop.permute.xlu0 %470  ;;  %v453_v17 = vpop.permute.xlu1 %452 }
 0x497   :  { %v476_v18 = vsel %vm435_vm3, %v471_v16, 0.0  ;;  %v459_v20 = vsel %vm435_vm3, %v453_v17, 0.0 }
 0x498   :  { %477 = vadd.xlane.f32.xlu0 %v476_v18 }
 0x49a   :  { %v473_v19 = vpop.permute.xlu1 %472  ;;  %v491_v23 = vpop.permute.xlu0 %490 }
 0x49b   :  { %v479_v21 = vsel %vm435_vm3, %v473_v19, 0.0  ;;  %v496_v25 = vsel %vm435_vm3, %v491_v23, 0.0 }
 0x49c   :  { %460 = vadd.xlane.f32.xlu0 %v459_v20  ;;  %480 = vadd.xlane.f32.xlu1 %v479_v21 }
 0x49e   :  { %v493_v22 = vpop.permute.xlu1 %492 }
 0x49f   :  { %v499_v24 = vsel %vm435_vm3, %v493_v22, 0.0 }
 0x4a0   :  { %497 = vadd.xlane.f32.xlu0 %v496_v25  ;;  %500 = vadd.xlane.f32.xlu1 %v499_v24 }
 0x4d0   :  { %v438_v35 = vpop.xlane.xlu0 %437 }
 0x4d1   :  { %v446_v49 = vmul.f32 %v2115_v44, %v438_v35  ;;  %v2166_v35 = vld [vmem:[%s2537_s5 + $0x70] sm:$0xff] }
 0x4d9   :  { %v441_v42 = vpop.xlane.xlu1 %440 }
 0x4da   :  { %v447_v51 = vmul.f32 %v2115_v44, %v441_v42  ;;  %v2189_v42 = vld [vmem:[%s2537_s5 + $0x68] sm:$0xff] }
 0x4e6   :  { %v428_v28 = vpop.f32.mrf.mxu0 }
 0x4e8   :  { %v1557_v29 = vpop.f32.mrf.mxu0 }
 0x4e9   :  { %v1678_v29 = vld [vmem:[%s2540_s8 + $0x10] sm:$0xff]  }
 0x4ea   :  { %v431_v30 = vpop.f32.mrf.mxu0 }
 0x4ec   :  { %v1558_v31 = vpop.f32.mrf.mxu0 }
 0x4ed   :  { %v2161_v31 = vld [vmem:[%s2537_s5 + $0x78] sm:$0xff] }
 0x51d   :  { %v458_v36 = vpop.xlane.xlu0 %457 }
 0x51e   :  { %v466_v46 = vmul.f32 %v2110_v41, %v458_v36  ;;  %v2175_v36 = vld [vmem:[%s2537_s5 + $0x60] sm:$0xff] }
 0x520   :  { %v468_v54 = vadd.f32 %v466_v46, %v446_v49  ;;  %v2203_v46 = vld [vmem:[%s2537_s5 + $0x58] sm:$0xff]  ;;  %v2222_v49 = vld [vmem:[%s2537_s5 + $0x20] sm:$0xff] }
 0x521   :  { %v478_v43 = vpop.xlane.xlu0 %477 }
 0x522   :  { %v486_v50 = vmul.f32 %v2118_v45, %v478_v43  ;;  %v2194_v43 = vld [vmem:[%s2537_s5 + $0x40] sm:$0xff] }
 0x524   :  { %v488_v61 = vadd.f32 %v486_v50, %v468_v54  ;;  %v2236_v50 = vld [vmem:[%s2537_s5 + $0x10] sm:$0xff]  ;;  %v2250_v54 = vld [vmem:[%s2537_s5] sm:$0xff] }
 0x525   :  { %v461_v47 = vpop.xlane.xlu0 %460  ;;  %v481_v48 = vpop.xlane.xlu1 %480 }
 0x526   :  { %v467_v52 = vmul.f32 %v2110_v41, %v461_v47  ;;  %v487_v56 = vmul.f32 %v2118_v45, %v481_v48  ;;  %v2208_v47 = vld [vmem:[%s2537_s5 + $0x30] sm:$0xff]  ;;  %v2217_v48 = vld [vmem:[%s2537_s5 + $0x48] sm:$0xff] }
 0x528   :  { %v469_v55 = vadd.f32 %v467_v52, %v447_v51  ;;  %v2231_v51 = vld [vmem:[%s2537_s5 + $0x38] sm:$0xff]  ;;  %v2245_v52 = vld [vmem:[%s2537_s5 + $0x28] sm:$0xff] }
 0x529   :  { %v498_v58 = vpop.xlane.xlu0 %497  ;;  %v501_v60 = vpop.xlane.xlu1 %500 }
 0x52a   :  { %v489_v62 = vadd.f32 %v487_v56, %v469_v55  ;;  %v506_v63 = vmul.f32 %v2128_v53, %v498_v58  ;;  %v507_v2 = vmul.f32 %v2128_v53, %v501_v60  ;;  %v2259_v55 = vld [vmem:[%s2537_s5 + $0x18] sm:$0xff]  ;;  %v2266_v56 = vld [vmem:[%s2537_s5 + $0x8] sm:$0xff] }
 0x52c   :  { %v508_v3 = vadd.f32 %v506_v63, %v488_v61  ;;  %v509_v4 = vadd.f32 %v507_v2, %v489_v62 }
 0x52e   :  { %1701 = vrcp.f32 %v508_v3  ;;  %v605_v3 = vsub.s32 2, %v1988_v32 }
 0x52f   :  { %1703 = vrcp.f32 %v509_v4 }
 0x53b   :  { %v1702_v5 = vpop.eup %1701 }
 0x53c   :  { %v1704_v6 = vpop.eup %1703  ;;  %v512_v7 = vmul.f32 %v1702_v5, %v428_v28  ;;  %v1677_v28 = vld [vmem:[%s2540_s8 + $0x18] sm:$0xff]  }
 0x53d   :  { %v513_v8 = vmul.f32 %v1704_v6, %v431_v30  ;;  %v1679_v30 = vld [vmem:[#allocation5 + $0x8] sm:$0xff]   ;;  %v606_v6 = vrot.slane %v1994_v34, %v605_v3 }
 0x53f   :  { %v514_v9 = vpack.c.bf16 %v513_v8, %v512_v7  ;;  %v611_v7 = vsub.s32 3, %v1988_v32 }
 0x541   :  { %1564 = vmatmul.mubr.msk.bf16.vlgmr.msra.gmra.mxu0 %vm89_vm0, %v514_v9 }
 0x542   :  { %1571 = vmatprep.mubr.msk.bf16.mxu0 %vm1818_vm1, %v1817_v15  ;;  %1568 = vmatpush3.bf16.msra.mxu0 %v1677_v28 }
 0x543   :  { %1569 = vmatprep.subr.bf16.mxu0 %v1817_v15 }
 0x546   :  { %1570 = vmatpush3.bf16.msra.mxu0 %v1678_v29 }
 0x547   :  { %1575 = vmatprep.subr.bf16.mxu0 %v1679_v30 }
 0x601   :  { %v568_v59 = vpop.f32.mrf.mxu0 }
 0x602   :  { %v569_v10 = vadd.f32 %v568_v59, %v518_v57  ;;  %v612_v59 = vrot.slane %v1994_v34, %v611_v7  ;;  %v683_v34 = vld [vmem:[%s2533_s1 + $0x10] sm:$0xff] }
 0x603   :  { %v1565_v11 = vpop.f32.mrf.mxu0 }
 0x604   :  { %v2138_v12 = vadd.f32 %v569_v10, %v1909_v0  ;;  %v681_v11 = vld [vmem:[%s2533_s1] sm:$0xff] }
 0x605   :  { %v571_v13 = vpop.f32.mrf.mxu0 }
 0x606   :  { %v572_v14 = vadd.f32 %v571_v13, %v518_v57  ;;  %v577_v16 = vsel %vm89_vm0, %v2138_v12, 0.0  ;;  %v682_v13 = vld [vmem:[%s2533_s1 + $0x8] sm:$0xff] }
 0x607   :  { %578 = vadd.xlane.f32.xlu0 %v577_v16  ;;  %v1566_v17 = vpop.f32.mrf.mxu0 }
 0x608   :  { %v2143_v18 = vadd.f32 %v572_v14, %v1914_v1  ;;  %v685_v17 = vpack.c.bf16 %v682_v13, %v681_v11 }
 0x60a   :  { %v580_v19 = vsel %vm89_vm0, %v2143_v18, 0.0 }
 0x60b   :  { %581 = vadd.xlane.f32.xlu1 %v580_v19 }
 0x690   :  { %v579_v20 = vpop.xlane.xlu0 %578 }
 0x691   :  { %v583_v21 = vmul.f32 0.03125, %v579_v20  ;;  %v1680_v20 = vld [vmem:[#allocation5] sm:$0xff]  }
 0x693   :  { %v585_v23 = vsub.f32 %v2138_v12, %v583_v21  ;;  %v684_v21 = vld [vmem:[%s2533_s1 + $0x18] sm:$0xff] }
 0x694   :  { %v582_v0 = vpop.xlane.xlu1 %581 }
 0x695   :  { %v584_v22 = vmul.f32 0.03125, %v582_v0  ;;  %v587_v25 = vmul.f32 %v585_v23, %v585_v23 }
 0x697   :  { %v586_v24 = vsub.f32 %v2143_v18, %v584_v22  ;;  %v589_v26 = vsel %vm89_vm0, %v587_v25, 0.0 }
 0x698   :  { %590 = vadd.xlane.f32.xlu0 %v589_v26 }
 0x699   :  { %v588_v27 = vmul.f32 %v586_v24, %v586_v24 }
 0x69b   :  { %v592_v1 = vsel %vm89_vm0, %v588_v27, 0.0 }
 0x69c   :  { %593 = vadd.xlane.f32.xlu1 %v592_v1 }
 0x6ad   :  { %848 = vrot.lane.b32.xlu1 %v2161_v31, %s1819_s24 }
 0x6ae   :  { %846 = vrot.lane.b32.xlu0 %v2166_v35, %s1819_s24 }
 0x6b1   :  { %842 = vrot.lane.b32.xlu1 %v2175_v36, %s1819_s24 }
 0x6b2   :  { %838 = vrot.lane.b32.xlu0 %v2180_v39, %s1819_s24 }
 0x6b5   :  { %844 = vrot.lane.b32.xlu1 %v2189_v42, %s1819_s24 }
 0x6b6   :  { %834 = vrot.lane.b32.xlu0 %v2194_v43, %s1819_s24 }
 0x6b9   :  { %840 = vrot.lane.b32.xlu1 %v2203_v46, %s1819_s24 }
 0x6ba   :  { %830 = vrot.lane.b32.xlu0 %v2208_v47, %s1819_s24 }
 0x6bd   :  { %836 = vrot.lane.b32.xlu1 %v2217_v48, %s1819_s24 }
 0x6be   :  { %826 = vrot.lane.b32.xlu0 %v2222_v49, %s1819_s24 }
 0x6c1   :  { %832 = vrot.lane.b32.xlu1 %v2231_v51, %s1819_s24 }
 0x6c2   :  { %822 = vrot.lane.b32.xlu0 %v2236_v50, %s1819_s24 }
 0x6c5   :  { %828 = vrot.lane.b32.xlu1 %v2245_v52, %s1819_s24 }
 0x6c6   :  { %818 = vrot.lane.b32.xlu0 %v2250_v54, %s1819_s24 }
 0x6c9   :  { %824 = vrot.lane.b32.xlu1 %v2259_v55, %s1819_s24 }
 0x6cd   :  { %820 = vrot.lane.b32.xlu1 %v2266_v56, %s1819_s24 }
 0x721   :  { %v591_v58 = vpop.xlane.xlu0 %590 }
 0x722   :  { %v595_v60 = vmul.f32 0.03125, %v591_v58 }
 0x724   :  { %v597_v61 = vadd.f32 1e-05, %v595_v60  ;;  %v624_v60 = vrot.slane %v2105_v40, %v119_v33 }
 0x725   :  { %v594_v62 = vpop.xlane.xlu1 %593  ;;  %v847_v25 = vpop.permute.xlu0 %846 }
 0x726   :  { %1705 = vrsqrt.f32 %v597_v61  ;;  %v596_v63 = vmul.f32 0.03125, %v594_v62 }
 0x728   :  { %v598_v2 = vadd.f32 1e-05, %v596_v63 }
 0x729   :  { %v849_v0 = vpop.permute.xlu1 %848  ;;  %v839_v26 = vpop.permute.xlu0 %838 }
 0x72a   :  { %1707 = vrsqrt.f32 %v598_v2 }
 0x72d   :  { %v843_v22 = vpop.permute.xlu1 %842  ;;  %v835_v1 = vpop.permute.xlu0 %834 }
 0x731   :  { %v831_v29 = vpop.permute.xlu0 %830 }
 0x733   :  { %v1706_v4 = vpop.eup %1705 }
 0x734   :  { %v601_v5 = vmul.f32 %v1706_v4, %v585_v23  ;;  %v686_v23 = vpack.c.bf16 %v684_v21, %v683_v34 }
 0x735   :  { %v827_v61 = vpop.permute.xlu0 %826 }
 0x736   :  { %v607_v57 = vmul.f32 %v606_v6, %v601_v5 }
 0x737   :  { %v1708_v8 = vpop.eup %1707 }
 0x738   :  { %v602_v9 = vmul.f32 %v1708_v8, %v586_v24  ;;  %v613_v14 = vadd.f32 %v612_v59, %v607_v57  ;;  %v845_v24 = vpop.permute.xlu1 %844  ;;  %v694_v8 = vrot.slane %v2105_v40, %v125_v38 }
 0x739   :  { %v823_v57 = vpop.permute.xlu0 %822 }
 0x73a   :  { %v608_v10 = vmul.f32 %v606_v6, %v602_v9 }
 0x73c   :  { %v614_v16 = vadd.f32 %v612_v59, %v608_v10  ;;  %v841_v27 = vpop.permute.xlu1 %840 }
 0x73e   :  { %v615_v19 = vpack.c.bf16 %v614_v16, %v613_v14  ;;  %v819_v16 = vpop.permute.xlu0 %818 }
 0x740   :  { %1572 = vmatmul.mubr.msk.bf16.vlgmr.msra.gmra.mxu0 %vm89_vm0, %v615_v19  ;;  %v837_v28 = vpop.permute.xlu1 %836 }
 0x741   :  { %1576 = vmatpush3.bf16.msra.mxu0 %v1679_v30  ;;  %1579 = vmatprep.mubr.msk.bf16.mxu0 %vm89_vm0, %v685_v17 }
 0x742   :  { %1577 = vmatprep.subr.bf16.mxu0 %v1680_v20 }
 0x744   :  { %v833_v30 = vpop.permute.xlu1 %832 }
 0x745   :  { %1578 = vmatpush3.bf16.msra.mxu0 %v1680_v20 }
 0x746   :  { %1583 = vmatprep.subr.bf16.mxu0 %v1817_v15 }
 0x748   :  { %1580 = vmatmul.mubr.msk.bf16.vlgmr.msra.gmra.mxu0 %vm89_vm0, %v686_v23  ;;  %v829_v63 = vpop.permute.xlu1 %828 }
 0x749   :  { %1599 = vmatprep.mubr.msk.bf16.mxu0 %vm1818_vm1, %v1817_v15 }
 0x74c   :  { %v825_v10 = vpop.permute.xlu1 %824 }
 0x750   :  { %v821_v20 = vpop.permute.xlu1 %820 }
 0x800   :  { %v674_v58 = vpop.f32.mrf.mxu0 }
 0x801   :  { %v2299_v4 = vadd.f32 %v674_v58, %v624_v60 }
 0x802   :  { %v1573_v62 = vpop.f32.mrf.mxu0 }
 0x804   :  { %v677_v2 = vpop.f32.mrf.mxu0 }
 0x805   :  { %v2301_v5 = vadd.f32 %v677_v2, %v624_v60 }
 0x806   :  { %v1574_v6 = vpop.f32.mrf.mxu0 }
 0x807   :  { %v897_v9 = vpack.c.bf16 %v2301_v5, %v2299_v4 }
 0x808   :  { %v1581_v59 = vpop.f32.mrf.mxu0 }
 0x809   :  { %v2308_v33 = vadd.f32 %v1581_v59, %v694_v8 }
 0x80a   :  { %v747_v11 = vpop.f32.mrf.mxu0 }
 0x80b   :  { %v2310_v13 = vadd.f32 %v747_v11, %v694_v8  ;;  %v880_v34 = vmul.f32 %v847_v25, %v2308_v33  ;;  %v792_v23 = vmul.f32 %v2166_v35, %v2308_v33  ;;  %v876_v59 = vmul.f32 %v839_v26, %v2308_v33 }
 0x80c   :  { %v1582_v14 = vpop.f32.mrf.mxu0 }
 0x80d   :  { %v2312_v17 = vadd.f32 %v1582_v14, %v694_v8  ;;  %v2323_v60 = vmul.f32 %v819_v16, %v2310_v13  ;;  %v878_v62 = vmul.f32 %v843_v22, %v2310_v13  ;;  %v874_v14 = vmul.f32 %v835_v1, %v2310_v13 }
 0x80e   :  { %v750_v19 = vpop.f32.mrf.mxu0  ;;  %v2349_v1 = vmul.f32 %v823_v57, %v2308_v33  ;;  %v788_v57 = vmul.f32 %v2180_v39, %v2308_v33  ;;  %v784_v39 = vmul.f32 %v2208_v47, %v2308_v33  ;;  %v780_v47 = vmul.f32 %v2236_v50, %v2308_v33 }
 0x80f   :  { %v2315_v38 = vadd.f32 %v750_v19, %v694_v8  ;;  %v881_v21 = vmul.f32 %v849_v0, %v2312_v17  ;;  %v793_v58 = vmul.f32 %v2161_v31, %v2312_v17  ;;  %v877_v2 = vmul.f32 %v841_v27, %v2312_v17 }
 0x810   :  { %v873_v26 = vmul.f32 %v833_v30, %v2312_v17  ;;  %v872_v19 = vmul.f32 %v831_v29, %v2308_v33 }
 0x811   :  { %v2328_v6 = vmul.f32 %v821_v20, %v2315_v38  ;;  %v889_v25 = vpack.c.bf16 %v881_v21, %v880_v34  ;;  %v801_v8 = vpack.c.bf16 %v793_v58, %v792_v23  ;;  %v879_v0 = vmul.f32 %v845_v24, %v2315_v38 }
 0x812   :  { %v875_v35 = vmul.f32 %v837_v28, %v2315_v38  ;;  %v791_v27 = vmul.f32 %v2189_v42, %v2315_v38  ;;  %v887_v24 = vpack.c.bf16 %v877_v2, %v876_v59  ;;  %v790_v28 = vmul.f32 %v2175_v36, %v2310_v13 }
 0x813   :  { %v882_v31 = vpack.c.bf16 %v2328_v6, %v2323_v60  ;;  %1003 = vrot.lane.b32.xlu0 %v889_v25, %s1820_s4  ;;  %v923_v22 = vsel %vm89_vm0, %v801_v8, 0  ;;  %v888_v11 = vpack.c.bf16 %v879_v0, %v878_v62  ;;  %v871_v42 = vmul.f32 %v829_v63, %v2315_v38 }
 0x814   :  { %1584 = vmatpush3.bf16.xpose.msra.mxu0 %v923_v22  ;;  %v886_v16 = vpack.c.bf16 %v875_v35, %v874_v14  ;;  %v800_v20 = vpack.c.bf16 %v791_v27, %v790_v28  ;;  %v2352_v34 = vmul.f32 %v825_v10, %v2312_v17  ;;  %v885_v30 = vpack.c.bf16 %v873_v26, %v872_v19  ;;  %v891_v26 = vld [vmem:[%s2535_s3 + $0x8] sm:$0xff] }
 0x815   :  { %1001 = vrot.lane.b32.xlu1 %v888_v11, %s1820_s4  ;;  %1585 = vmatprep.subr.bf16.mxu0 %v1817_v15  ;;  %v870_v21 = vmul.f32 %v827_v61, %v2310_v13  ;;  %v789_v63 = vmul.f32 %v2203_v46, %v2312_v17  ;;  %v787_v58 = vmul.f32 %v2217_v48, %v2315_v38 }
 0x816   :  { %v883_v36 = vpack.c.bf16 %v2352_v34, %v2349_v1  ;;  %v920_v29 = vsel %vm89_vm0, %v800_v20, 0  ;;  %v786_v46 = vmul.f32 %v2194_v43, %v2310_v13  ;;  %v785_v25 = vmul.f32 %v2231_v51, %v2312_v17 }
 0x817   :  { %999 = vrot.lane.b32.xlu0 %v887_v24, %s1820_s4  ;;  %v884_v23 = vpack.c.bf16 %v871_v42, %v870_v21  ;;  %v799_v61 = vpack.c.bf16 %v789_v63, %v788_v57  ;;  %v783_v0 = vmul.f32 %v2245_v52, %v2315_v38  ;;  %v782_v43 = vmul.f32 %v2222_v49, %v2310_v13 }
 0x818   :  { %v798_v62 = vpack.c.bf16 %v787_v58, %v786_v46  ;;  %v797_v8 = vpack.c.bf16 %v785_v25, %v784_v39  ;;  %v781_v35 = vmul.f32 %v2259_v55, %v2312_v17  ;;  %v779_v11 = vmul.f32 %v2266_v56, %v2315_v38 }
 0x819   :  { %997 = vrot.lane.b32.xlu1 %v886_v16, %s1820_s4  ;;  %v917_v10 = vsel %vm89_vm0, %v799_v61, 0  ;;  %v796_v59 = vpack.c.bf16 %v783_v0, %v782_v43  ;;  %v778_v49 = vmul.f32 %v2250_v54, %v2310_v13  ;;  %v1681_v43 = vld [vmem:[%s2540_s8 + $0x28] sm:$0xff]  }
 0x81a   :  { %v914_v2 = vsel %vm89_vm0, %v798_v62, 0  ;;  %v911_v48 = vsel %vm89_vm0, %v797_v8, 0  ;;  %v795_v22 = vpack.c.bf16 %v781_v35, %v780_v47 }
 0x81b   :  { %995 = vrot.lane.b32.xlu0 %v885_v30, %s1820_s4  ;;  %v908_v51 = vsel %vm89_vm0, %v796_v59, 0  ;;  %v794_v27 = vpack.c.bf16 %v779_v11, %v778_v49  ;;  %v1682_v59 = vld [vmem:[%s2540_s8 + $0x20] sm:$0xff]  }
 0x81c   :  { %1586 = vmatpush3.bf16.xpose.msra.mxu0 %v920_v29  ;;  %v905_v52 = vsel %vm89_vm0, %v795_v22, 0 }
 0x81d   :  { %993 = vrot.lane.b32.xlu1 %v884_v23, %s1820_s4  ;;  %1587 = vmatprep.subr.bf16.mxu0 %v1817_v15  ;;  %v902_v55 = vsel %vm89_vm0, %v794_v27, 0 }
 0x824   :  { %1588 = vmatpush3.bf16.xpose.msra.mxu0 %v917_v10 }
 0x825   :  { %1589 = vmatprep.subr.bf16.mxu0 %v1817_v15 }
 0x82c   :  { %1590 = vmatpush3.bf16.xpose.msra.mxu0 %v914_v2 }
 0x82d   :  { %1591 = vmatprep.subr.bf16.mxu0 %v1817_v15 }
 0x834   :  { %1592 = vmatpush3.bf16.xpose.msra.mxu0 %v911_v48 }
 0x835   :  { %1593 = vmatprep.subr.bf16.mxu0 %v1817_v15 }
 0x83c   :  { %1594 = vmatpush3.bf16.xpose.msra.mxu0 %v908_v51 }
 0x83d   :  { %1595 = vmatprep.subr.bf16.mxu0 %v1817_v15 }
 0x844   :  { %1596 = vmatpush3.bf16.xpose.msra.mxu0 %v905_v52 }
 0x845   :  { %1597 = vmatprep.subr.bf16.mxu0 %v1817_v15 }
 0x84c   :  { %1598 = vmatpush3.bf16.xpose.msra.mxu0 %v902_v55 }
 0x853   :  { %1600 = vmatmul.mubr.msk.bf16.vlgmr.msra.gmra.mxu0 %vm89_vm0, %v897_v9  ;;  %v890_v9 = vld [vmem:[%s2535_s3] sm:$0xff] }
 0x885   :  { %v1004_v50 = vpop.permute.xlu0 %1003 }
 0x886   :  { %1604 = vmatpush3.bf16.msra.mxu1 %v1004_v50 }
 0x887   :  { %1605 = vmatprep.subr.bf16.mxu1 %v1817_v15  ;;  %v1002_v56 = vpop.permute.xlu1 %1001 }
 0x889   :  { %v1000_v33 = vpop.permute.xlu0 %999 }
 0x88a   :  { %1606 = vmatpush3.bf16.msra.mxu1 %v1002_v56 }
 0x88b   :  { %1607 = vmatprep.subr.bf16.mxu1 %v1817_v15  ;;  %v998_v54 = vpop.permute.xlu1 %997 }
 0x88d   :  { %v996_v13 = vpop.permute.xlu0 %995 }
 0x88e   :  { %1608 = vmatpush3.bf16.msra.mxu1 %v1000_v33 }
 0x88f   :  { %1609 = vmatprep.subr.bf16.mxu1 %v1817_v15  ;;  %v994_v4 = vpop.permute.xlu1 %993 }
 0x892   :  { %1610 = vmatpush3.bf16.msra.mxu1 %v998_v54 }
 0x893   :  { %1611 = vmatprep.subr.bf16.mxu1 %v1817_v15 }
 0x896   :  { %1612 = vmatpush3.bf16.msra.mxu1 %v996_v13 }
 0x897   :  { %1613 = vmatprep.subr.bf16.mxu1 %v1817_v15 }
 0x89a   :  { %1614 = vmatpush3.bf16.msra.mxu1 %v994_v4 }
 0x89b   :  { %1615 = vmatprep.subr.bf16.mxu1 %v1817_v15 }
 0x913   :  { %v959_v5 = vpop.f32.mrf.mxu0 }
 0x914   :  { %v966_v17 = vmul.f32 0.35355338, %v959_v5 }
 0x915   :  { %v1601_v38 = vpop.f32.mrf.mxu0 }
 0x916   :  { %v968_v14 = vadd.f32 %v966_v17, %v890_v9 }
 0x917   :  { %v962_v24 = vpop.f32.mrf.mxu0 }
 0x918   :  { %v967_v28 = vmul.f32 0.35355338, %v962_v24  ;;  %970 = vmax.xlane.f32.xlu0 %v968_v14 }
 0x919   :  { %v1602_v16 = vpop.f32.mrf.mxu0 }
 0x91a   :  { %v969_v19 = vadd.f32 %v967_v28, %v891_v26 }
 0x91c   :  { %972 = vmax.xlane.f32.xlu1 %v969_v19 }
 0x92d   :  { %989 = vrot.lane.b32.xlu1 %v882_v31, %s1820_s4 }
 0x92e   :  { %991 = vrot.lane.b32.xlu0 %v883_v36, %s1820_s4 }
 0x9a1   :  { %v971_v20 = vpop.xlane.xlu0 %970 }
 0x9a2   :  { %v974_v42 = vsub.f32 %v968_v14, %v971_v20 }
 0x9a4   :  { %v976_v30 = vmul.f32 1.442695, %v974_v42 }
 0x9a5   :  { %v992_v21 = vpop.permute.xlu0 %991  ;;  %v973_v29 = vpop.xlane.xlu1 %972 }
 0x9a6   :  { %1709 = vpow2.f32 %v976_v30  ;;  %v975_v23 = vsub.f32 %v969_v19, %v973_v29  ;;  %1616 = vmatpush3.bf16.msra.mxu1 %v992_v21 }
 0x9a7   :  { %1617 = vmatprep.subr.bf16.mxu1 %v1817_v15 }
 0x9a8   :  { %v978_v63 = vmul.f32 1.442695, %v975_v23 }
 0x9a9   :  { %v990_v57 = vpop.permute.xlu1 %989 }
 0x9aa   :  { %1711 = vpow2.f32 %v978_v63  ;;  %1618 = vmatpush3.bf16.msra.mxu1 %v990_v57 }
 0x9ab   :  { %1623 = vmatprep.subr.bf16.mxu1 %v1817_v15 }
 0x9b3   :  { %v1710_v60 = vpop.eup %1709 }
 0x9b4   :  { %1064 = vrot.lane.b32.xlu0 %v1710_v60, %s1820_s4  ;;  %v1054_v1 = vsel %vm89_vm0, %v1710_v60, 0.0 }
 0x9b7   :  { %v1712_v6 = vpop.eup %1711 }
 0x9b8   :  { %1080 = vrot.lane.b32.xlu0 %v1710_v60, %s1814_s26  ;;  %1066 = vrot.lane.b32.xlu1 %v1712_v6, %s1820_s4  ;;  %v980_v31 = vpack.c.bf16 %v1712_v6, %v1710_v60  ;;  %v1057_v34 = vsel %vm89_vm0, %v1712_v6, 0.0 }
 0x9ba   :  { %1620 = vmatmul.mubr.bf16.vlgmr.msra.gmra.mxu1 %v980_v31 }
 0x9bb   :  { %1627 = vmatprep.mubr.msk.bf16.mxu1 %vm1818_vm1, %v1817_v15  ;;  %1624 = vmatpush3.bf16.msra.mxu1 %v1681_v43 }
 0x9bc   :  { %1096 = vrot.lane.b32.xlu0 %v1710_v60, %s1819_s24  ;;  %1082 = vrot.lane.b32.xlu1 %v1712_v6, %s1814_s26 }
 0x9bd   :  { %1625 = vmatprep.subr.bf16.mxu1 %v1817_v15 }
 0x9bf   :  { %1626 = vmatpush3.bf16.msra.mxu1 %v1682_v59 }
 0x9c0   :  { %1098 = vrot.lane.b32.xlu1 %v1712_v6, %s1819_s24  ;;  %1631 = vmatprep.subr.bf16.mxu1 %v1817_v15 }
 0x9db   :  { %1055 = vadd.xlane.f32.xlu0 %v1054_v1 }
 0x9e4   :  { %1058 = vadd.xlane.f32.xlu1 %v1057_v34 }
 0xa26   :  { %v1065_v36 = vpop.permute.xlu0 %1064 }
 0xa27   :  { %v1070_v61 = vsel %vm89_vm0, %v1065_v36, 0.0 }
 0xa28   :  { %1071 = vadd.xlane.f32.xlu0 %v1070_v61 }
 0xa2a   :  { %v1081_v10 = vpop.permute.xlu0 %1080  ;;  %v1067_v58 = vpop.permute.xlu1 %1066 }
 0xa2b   :  { %v1086_v46 = vsel %vm89_vm0, %v1081_v10, 0.0  ;;  %v1073_v2 = vsel %vm89_vm0, %v1067_v58, 0.0 }
 0xa2c   :  { %1087 = vadd.xlane.f32.xlu0 %v1086_v46 }
 0xa2e   :  { %v1083_v62 = vpop.permute.xlu1 %1082  ;;  %v1097_v39 = vpop.permute.xlu0 %1096 }
 0xa2f   :  { %v1089_v25 = vsel %vm89_vm0, %v1083_v62, 0.0  ;;  %v1102_v48 = vsel %vm89_vm0, %v1097_v39, 0.0  ;;  %v1684_v39 = vld [vmem:[#allocation7] sm:$0xff]  }
 0xa30   :  { %1074 = vadd.xlane.f32.xlu0 %v1073_v2  ;;  %1090 = vadd.xlane.f32.xlu1 %v1089_v25  ;;  %v1683_v25 = vld [vmem:[#allocation7 + $0x8] sm:$0xff]  }
 0xa32   :  { %v1099_v8 = vpop.permute.xlu1 %1098 }
 0xa33   :  { %v1105_v0 = vsel %vm89_vm0, %v1099_v8, 0.0 }
 0xa34   :  { %1103 = vadd.xlane.f32.xlu0 %v1102_v48  ;;  %1106 = vadd.xlane.f32.xlu1 %v1105_v0 }
 0xa64   :  { %v1056_v52 = vpop.xlane.xlu0 %1055 }
 0xa65   :  { %v1060_v33 = vmul.f32 %v1056_v52, %v2115_v44  ;;  %v1725_v52 = vld [vmem:[%s2543_s11] sm:$0xff] }
 0xa6d   :  { %v1059_v49 = vpop.xlane.xlu1 %1058 }
 0xa6e   :  { %v1061_v54 = vmul.f32 %v1059_v49, %v2115_v44 }
 0xa7a   :  { %v1047_v51 = vpop.f32.mrf.mxu1 }
 0xa7c   :  { %v1621_v35 = vpop.f32.mrf.mxu1 }
 0xa7d   :  { %v1207_v35 = vsub.s32 4, %v1988_v32 }
 0xa7e   :  { %v1050_v47 = vpop.f32.mrf.mxu1 }
 0xa80   :  { %v1622_v22 = vpop.f32.mrf.mxu1 }
 0xab1   :  { %v1072_v11 = vpop.xlane.xlu0 %1071 }
 0xab2   :  { %v1076_v55 = vmul.f32 %v1072_v11, %v2110_v41  ;;  %v1208_v11 = vrot.slane %v1725_v52, %v1207_v35 }
 0xab4   :  { %v1078_v5 = vadd.f32 %v1076_v55, %v1060_v33 }
 0xab5   :  { %v1088_v27 = vpop.xlane.xlu0 %1087 }
 0xab6   :  { %v1092_v13 = vmul.f32 %v1088_v27, %v2118_v45  ;;  %v1214_v27 = vrot.slane %v1725_v52, %v444_v37  ;;  %v1686_v37 = vld [vmem:[%s2542_s10 + $0x30] sm:$0xff]  }
 0xab8   :  { %v1094_v24 = vadd.f32 %v1092_v13, %v1078_v5  ;;  %v1687_v5 = vld [vmem:[%s2542_s10 + $0x28] sm:$0xff]  }
 0xab9   :  { %v1075_v50 = vpop.xlane.xlu0 %1074  ;;  %v1091_v56 = vpop.xlane.xlu1 %1090 }
 0xaba   :  { %v1077_v4 = vmul.f32 %v1075_v50, %v2110_v41  ;;  %v1093_v17 = vmul.f32 %v1091_v56, %v2118_v45  ;;  %v1120_v45 = vrot.slane %v2105_v40, %v605_v3 }
 0xabc   :  { %v1079_v9 = vadd.f32 %v1077_v4, %v1061_v54  ;;  %v1685_v4 = vld [vmem:[%s2542_s10 + $0x38] sm:$0xff]  }
 0xabd   :  { %v1104_v38 = vpop.xlane.xlu0 %1103  ;;  %v1107_v14 = vpop.xlane.xlu1 %1106 }
 0xabe   :  { %v1095_v26 = vadd.f32 %v1093_v17, %v1079_v9  ;;  %v1108_v28 = vmul.f32 %v2128_v53, %v1104_v38  ;;  %v1109_v16 = vmul.f32 %v2128_v53, %v1107_v14  ;;  %v1688_v9 = vld [vmem:[%s2542_s10 + $0x20] sm:$0xff]   ;;  %v1689_v17 = vld [vmem:[%s2542_s10 + $0x18] sm:$0xff]   ;;  %v1690_v38 = vld [vmem:[%s2542_s10 + $0x10] sm:$0xff]  }
 0xabf   :  { %v1691_v14 = vld [vmem:[%s2542_s10 + $0x8] sm:$0xff]  }
 0xac0   :  { %v1110_v19 = vadd.f32 %v1108_v28, %v1094_v24  ;;  %v1111_v20 = vadd.f32 %v1109_v16, %v1095_v26  ;;  %v1692_v24 = vld [vmem:[%s2542_s10] sm:$0xff]   ;;  %v1225_v26 = vrot.slane %v2105_v40, %v611_v7  ;;  %s1823_s10 = smov [#allocation8]  }
 0xac1   :  { %s1419_s13 = sshll.u32 %s1823_s10, 4  ;;  %s1420_s13 = int_to_ptr.vmem [resolvable:$true] %s1419_s13 }
 0xac2   :  { %1713 = vrcp.f32 %v1110_v19  ;;  %s1786_s14 = scalar_lea.vmem %s1420_s13, 256  ;;  %p1791_p2 = scmp.lt.s32.totalorder %s1420_s13, %s1420_s13 }
 0xac3   :  { %1715 = vrcp.f32 %v1111_v20  ;;  %p1787_p1 = scmp.ne.s32.totalorder %s1420_s13, %s1786_s14  ;;  %p1792_p3 = scmp.lt.s32.totalorder %s1786_s14, %s1786_s14 }
 0xac5   :  { %p1793_p4 = por %p1792_p3, %p1791_p2 }
 0xac7   :  { %p1794_p5 = pnand %p1793_p4, %p1787_p1 }
 0xacf   :  { %v1714_v44 = vpop.eup %1713 }
 0xad0   :  { %v1716_v42 = vpop.eup %1715  ;;  %v1114_v30 = vmul.f32 %v1714_v44, %v1047_v51 }
 0xad1   :  { %v1115_v41 = vmul.f32 %v1716_v42, %v1050_v47 }
 0xad3   :  { %v1116_v21 = vpack.c.bf16 %v1115_v41, %v1114_v30 }
 0xad5   :  { %1628 = vmatmul.mubr.msk.bf16.vlgmr.msra.gmra.mxu1 %vm89_vm0, %v1116_v21 }
 0xad6   :  { %1635 = vmatprep.mubr.msk.bf16.mxu1 %vm1818_vm1, %v1817_v15  ;;  %1632 = vmatpush3.bf16.msra.mxu1 %v1683_v25 }
 0xad7   :  { %1633 = vmatprep.subr.bf16.mxu1 %v1817_v15 }
 0xada   :  { %1634 = vmatpush3.bf16.msra.mxu1 %v1684_v39 }
 0xadb   :  { %1639 = vmatprep.subr.bf16.mxu1 %v1817_v15 }
 0xb95   :  { %v1170_v29 = vpop.f32.mrf.mxu1 }
 0xb96   :  { %v1171_v53 = vadd.f32 %v1170_v29, %v1120_v45 }
 0xb97   :  { %v1629_v23 = vpop.f32.mrf.mxu1 }
 0xb98   :  { %v2462_v63 = vadd.f32 %v1171_v53, %v2138_v12 }
 0xb99   :  { %v1173_v57 = vpop.f32.mrf.mxu1 }
 0xb9a   :  { %v1174_v60 = vadd.f32 %v1173_v57, %v1120_v45  ;;  %v1179_v6 = vsel %vm89_vm0, %v2462_v63, 0.0 }
 0xb9b   :  { %1180 = vadd.xlane.f32.xlu0 %v1179_v6  ;;  %v1630_v31 = vpop.f32.mrf.mxu1 }
 0xb9c   :  { %v2467_v1 = vadd.f32 %v1174_v60, %v2143_v18 }
 0xb9e   :  { %v1182_v34 = vsel %vm89_vm0, %v2467_v1, 0.0 }
 0xb9f   :  { %1183 = vadd.xlane.f32.xlu1 %v1182_v34 }
 0xc24   :  { %v1181_v3 = vpop.xlane.xlu0 %1180 }
 0xc25   :  { %v1185_v36 = vmul.f32 0.03125, %v1181_v3 }
 0xc27   :  { %v1187_v61 = vsub.f32 %v2462_v63, %v1185_v36 }
 0xc28   :  { %v1184_v12 = vpop.xlane.xlu1 %1183 }
 0xc29   :  { %v1186_v10 = vmul.f32 0.03125, %v1184_v12  ;;  %v1189_v58 = vmul.f32 %v1187_v61, %v1187_v61 }
 0xc2b   :  { %v1188_v46 = vsub.f32 %v2467_v1, %v1186_v10  ;;  %v1191_v62 = vsel %vm89_vm0, %v1189_v58, 0.0  ;;  %v1320_v58 = vrot.slane %v2105_v40, %v1207_v35 }
 0xc2c   :  { %1192 = vadd.xlane.f32.xlu0 %v1191_v62 }
 0xc2d   :  { %v1190_v2 = vmul.f32 %v1188_v46, %v1188_v46 }
 0xc2f   :  { %v1194_v18 = vsel %vm89_vm0, %v1190_v2, 0.0 }
 0xc30   :  { %1195 = vadd.xlane.f32.xlu1 %v1194_v18 }
 0xcb5   :  { %v1193_v8 = vpop.xlane.xlu0 %1192 }
 0xcb6   :  { %v1197_v48 = vmul.f32 0.03125, %v1193_v8 }
 0xcb8   :  { %v1199_v0 = vadd.f32 1e-05, %v1197_v48 }
 0xcb9   :  { %v1196_v43 = vpop.xlane.xlu1 %1195 }
 0xcba   :  { %1717 = vrsqrt.f32 %v1199_v0  ;;  %v1198_v59 = vmul.f32 0.03125, %v1196_v43 }
 0xcbc   :  { %v1200_v51 = vadd.f32 1e-05, %v1198_v59 }
 0xcbe   :  { %1719 = vrsqrt.f32 %v1200_v51 }
 0xcc7   :  { %v1718_v47 = vpop.eup %1717 }
 0xcc8   :  { %v1203_v22 = vmul.f32 %v1718_v47, %v1187_v61 }
 0xcca   :  { %v1209_v50 = vmul.f32 %v1208_v11, %v1203_v22 }
 0xccb   :  { %v1720_v49 = vpop.eup %1719 }
 0xccc   :  { %v1204_v55 = vmul.f32 %v1720_v49, %v1188_v46  ;;  %v1215_v33 = vadd.f32 %v1214_v27, %v1209_v50 }
 0xcce   :  { %v1210_v56 = vmul.f32 %v1208_v11, %v1204_v55 }
 0xcd0   :  { %v1216_v54 = vadd.f32 %v1214_v27, %v1210_v56 }
 0xcd2   :  { %v1217_v13 = vpack.c.bf16 %v1216_v54, %v1215_v33 }
 0xcd4   :  { %1636 = vmatmul.mubr.msk.bf16.vlgmr.msra.gmra.mxu1 %vm89_vm0, %v1217_v13 }
 0xcd5   :  { %1655 = vmatprep.mubr.msk.bf16.mxu1 %vm1818_vm1, %v1817_v15  ;;  %1640 = vmatpush3.bf16.msra.mxu1 %v1685_v4 }
 0xcd6   :  { %1641 = vmatprep.subr.bf16.mxu1 %v1817_v15 }
 0xcd9   :  { %1642 = vmatpush3.bf16.msra.mxu1 %v1686_v37 }
 0xcda   :  { %1643 = vmatprep.subr.bf16.mxu1 %v1817_v15 }
 0xcdd   :  { %1644 = vmatpush3.bf16.msra.mxu1 %v1687_v5 }
 0xcde   :  { %1645 = vmatprep.subr.bf16.mxu1 %v1817_v15 }
 0xce1   :  { %1646 = vmatpush3.bf16.msra.mxu1 %v1688_v9 }
 0xce2   :  { %1647 = vmatprep.subr.bf16.mxu1 %v1817_v15 }
 0xce5   :  { %1648 = vmatpush3.bf16.msra.mxu1 %v1689_v17 }
 0xce6   :  { %1649 = vmatprep.subr.bf16.mxu1 %v1817_v15 }
 0xce9   :  { %1650 = vmatpush3.bf16.msra.mxu1 %v1690_v38 }
 0xcea   :  { %1651 = vmatprep.subr.bf16.mxu1 %v1817_v15 }
 0xced   :  { %1652 = vmatpush3.bf16.msra.mxu1 %v1691_v14 }
 0xcee   :  { %1653 = vmatprep.subr.bf16.mxu1 %v1817_v15 }
 0xcf1   :  { %1654 = vmatpush3.bf16.msra.mxu1 %v1692_v24 }
 0xd94   :  { %v1275_v28 = vpop.f32.mrf.mxu1 }
 0xd95   :  { %v1276_v16 = vadd.f32 %v1275_v28, %v1225_v26 }
 0xd96   :  { %v1637_v19 = vpop.f32.mrf.mxu1 }
 0xd97   :  { %v1282_v20 = vmul.f32 %v1276_v16, %v1276_v16 }
 0xd98   :  { %v1278_v44 = vpop.f32.mrf.mxu1 }
 0xd99   :  { %v1284_v42 = vmul.f32 %v1282_v20, %v1276_v16  ;;  %v1279_v30 = vadd.f32 %v1278_v44, %v1225_v26 }
 0xd9a   :  { %v1638_v41 = vpop.f32.mrf.mxu1 }
 0xd9b   :  { %v1286_v21 = vmul.f32 0.044715, %v1284_v42  ;;  %v1283_v45 = vmul.f32 %v1279_v30, %v1279_v30 }
 0xd9d   :  { %v1288_v29 = vadd.f32 %v1286_v21, %v1276_v16  ;;  %v1285_v53 = vmul.f32 %v1283_v45, %v1279_v30 }
 0xd9f   :  { %v1290_v23 = vmul.f32 0.7978846, %v1288_v29  ;;  %v1287_v57 = vmul.f32 0.044715, %v1285_v53 }
 0xda1   :  { %1721 = vtanh.f32 %v1290_v23  ;;  %v1289_v15 = vadd.f32 %v1287_v57, %v1279_v30 }
 0xda3   :  { %v1291_v60 = vmul.f32 0.7978846, %v1289_v15 }
 0xda5   :  { %1723 = vtanh.f32 %v1291_v60 }
 0xdae   :  { %v1722_v6 = vpop.eup %1721 }
 0xdaf   :  { %v1294_v7 = vadd.f32 1.0, %v1722_v6 }
 0xdb1   :  { %v1296_v34 = vmul.f32 0.5, %v1294_v7 }
 0xdb2   :  { %v1724_v31 = vpop.eup %1723 }
 0xdb3   :  { %v1295_v3 = vadd.f32 1.0, %v1724_v31  ;;  %v1298_v61 = vmul.f32 %v1296_v34, %v1276_v16 }
 0xdb5   :  { %v1297_v36 = vmul.f32 0.5, %v1295_v3 }
 0xdb7   :  { %v1299_v12 = vmul.f32 %v1297_v36, %v1279_v30 }
 0xdb9   :  { %v1300_v10 = vpack.c.bf16 %v1299_v12, %v1298_v61 }
 0xdbb   :  { %1656 = vmatmul.mubr.bf16.vlgmr.msra.gmra.mxu1 %v1300_v10 }
 0xe7b   :  { %v1403_v46 = vpop.f32.mrf.mxu1 }
 0xe7c   :  { %v1404_v62 = vadd.f32 %v1403_v46, %v1320_v58 }
 0xe7d   :  { %v1657_v2 = vpop.f32.mrf.mxu1 }
 0xe7e   :  { %v1410_v18 = vadd.f32 %v1404_v62, %v2462_v63 }
 0xe7f   :  { %v1406_v25 = vpop.f32.mrf.mxu1 }
 0xe80   :  { %1412 = vst.msk [vmem:[#allocation8] sm:$0xff] %vm89_vm0, %v1410_v18  ;;  %v1407_v39 = vadd.f32 %v1406_v25, %v1320_v58 }
 0xe81   :  { %v1658_v8 = vpop.f32.mrf.mxu1 }
 0xe82   :  { %v1411_v48 = vadd.f32 %v1407_v39, %v2467_v1 }
 0xe84   :  { %1413 = vst.msk [vmem:[#allocation8 + $0x8] sm:$0xff] %vm89_vm0, %v1411_v48 }
 0xe85   :  { %1797 = shalt.err (!%p1794_p5)
}
 0xe86   :  { %s1824_s15 = smov 128   ;;  %s1825_s1 = smov 8  }
 0xe87   :  { %1425 = dma.vmem_to_hbm [thread:$0]  %s1420_s13, 256, %s2544_s12, [#allocation4], %s1824_s15, %s1824_s15, %s1825_s1  }
 0xe88   :  { %1810 = dma.done.wait [#allocation4], 256  }
 0xe89   :  { %1811 = vsyncadd [#allocation4], 4294967040 }
 0xe8a   :  { %1429 = vsyncpa [#allocation3], 1 }
 0xe8b   :  { %1430 = vsyncpa [#allocation6], 1 }
 0xe8c   :  { %1431 = vsyncpa [#allocation4], 1 }

</bundles_post_ra>
